<compile_context>
chip_gen: v7x
topology: tpu7x:2x2x1
jax: 0.10.0
libtpu: 0.0.40
codegen_flags: <defaults>
</compile_context>

<pallas_src>
import jax
import jax.numpy as jnp
from jax import lax
from jax.experimental import pallas as pl
from jax.experimental.pallas import tpu as pltpu


def _elu(x):
    # F.elu(alpha=1.0). exp(min(x,0))-1 avoids overflow in the unselected
    # branch and lowers cleanly in Mosaic (expm1 has no guaranteed lowering).
    return jnp.where(x > 0, x, jnp.exp(jnp.minimum(x, 0.0)) - 1.0)


def mlp_kernel(x_ref, w1_ref, b1_ref, w2_ref, b2_ref, w3_ref, b3_ref, o_ref):
    cdt = w1_ref.dtype  # f32 (exact path) or bf16 (v6e/v7x fast path)
    prec = lax.Precision.HIGHEST if cdt == jnp.float32 else None

    x_blk = x_ref[...].astype(cdt)            # [TB, 10] batch-major, contiguous

    # Layer 1: Linear(10 -> 64). Contract x's last axis so the result is
    # feature-major [64, TB] (batch on lanes); Mosaic handles the small
    # transpose on the otherwise-idle XLU / as a transposed-RHS matmul.
    h = lax.dot_general(
        w1_ref[...], x_blk, (((1,), (1,)), ((), ())),
        precision=prec, preferred_element_type=jnp.float32) + b1_ref[...]
    h = _elu(h.astype(cdt))                   # dropout = identity (eval mode)

    # Layer 2: Linear(64 -> 64)
    h = jnp.dot(w2_ref[...], h, precision=prec,
                preferred_element_type=jnp.float32) + b2_ref[...]
    h = _elu(h.astype(cdt))                   # dropout = identity (eval mode)

    # Layer 3: Linear(64 -> 1) -> lane-dense [1, TB] output slab
    o = jnp.dot(w3_ref[...], h, precision=prec,
                preferred_element_type=jnp.float32) + b3_ref[...]
    o_ref[...] = o.astype(o_ref.dtype)


def _round_up(n, m):
    return ((n + m - 1) // m) * m


def mlp_forward(x, params, *, block_batch=8192, min_grid_steps=2, use_bf16=False):
    """x: [B, 10] float32 -> [B] float32 (matches out.squeeze(dim=-1))."""
    w1, b1, w2, b2, w3, b3 = params
    B, F = x.shape

    # Batch tile (lane axis): multiple of 128, large to amortize per-step
    # overhead, capped so grid >= min_grid_steps (v7x megacore sharding).
    TB = min(block_batch, _round_up(B, 128))
    if B > 128 * min_grid_steps:
        TB = min(TB, _round_up(pl.cdiv(B, min_grid_steps), 128))
    TB = max(TB, 128)
    G = pl.cdiv(B, TB)
    Bp = G * TB

    # Only pad when the whole batch is smaller than one tile (tiny copy).
    # Otherwise rely on Pallas boundary-block clipping: no HBM pad pass and
    # no transpose pass at all; out-of-range columns are sliced away below.
    x_in = x if B >= TB else jnp.pad(x, ((0, TB - B), (0, 0)))

    if use_bf16:
        # bf16 matmul inputs + bf16 VPU/EUP elementwise (v6e / v7x).
        w1, w2, w3 = (w.astype(jnp.bfloat16) for w in (w1, w2, w3))

    const = lambda a: pl.BlockSpec(a.shape, lambda i, _nd=a.ndim: (0,) * _nd)

    out = pl.pallas_call(
        mlp_kernel,
        out_shape=jax.ShapeDtypeStruct((1, Bp), jnp.float32),
        grid=(G,),
        in_specs=[
            pl.BlockSpec((TB, F), lambda i: (i, 0)),        # x tile (pipelined)
            const(w1), const(b1), const(w2), const(b2), const(w3), const(b3),
        ],
        out_specs=pl.BlockSpec((1, TB), lambda i: (0, i)),  # lane-dense output
        compiler_params=pltpu.CompilerParams(
            dimension_semantics=("parallel",),
        ),
    )(x_in, w1, b1, w2, b2, w3, b3)

    # squeeze(dim=-1) + drop padded / clipped columns — pure glue.
    return out[0, :B]


def init_params(key):
    """Deterministic params; weights in native [out, in] layout, biases [out, 1]."""
    k1, k2, k3, k4, k5, k6 = jax.random.split(key, 6)
    w1 = jax.random.uniform(k1, (64, 10), jnp.float32, -0.3, 0.3)
    b1 = jax.random.uniform(k2, (64, 1), jnp.float32, -0.3, 0.3)
    w2 = jax.random.uniform(k3, (64, 64), jnp.float32, -0.125, 0.125)
    b2 = jax.random.uniform(k4, (64, 1), jnp.float32, -0.125, 0.125)
    w3 = jax.random.uniform(k5, (1, 64), jnp.float32, -0.125, 0.125)
    b3 = jax.random.uniform(k6, (1, 1), jnp.float32, -0.125, 0.125)
    return (w1, b1, w2, b2, w3, b3)


def reference_forward(x, params):
    """Pure-JAX reference (batch-major, like PyTorch) for correctness checks."""
    w1, b1, w2, b2, w3, b3 = params
    hp = lax.Precision.HIGHEST
    h = _elu(jnp.dot(x, w1.T, precision=hp) + b1[:, 0])
    h = _elu(jnp.dot(h, w2.T, precision=hp) + b2[:, 0])
    o = jnp.dot(h, w3.T, precision=hp) + b3[:, 0]
    return o[:, 0]


if __name__ == "__main__":
    key = jax.random.PRNGKey(0)
    kx, kp = jax.random.split(key)
    params = init_params(kp)

    # Primary small test (B < one tile -> tiny internal pad).
    B = 8
    x = jax.random.normal(kx, (B, 10), jnp.float32)
    y = jax.block_until_ready(mlp_forward(x, params))
    y_ref = reference_forward(x, params)
    assert y.shape == (B,), y.shape
    assert jnp.allclose(y, y_ref, atol=1e-4, rtol=1e-4), (y, y_ref)

    # Multi-tile grid with a clipped boundary block (no pad, no transpose).
    B2 = 300
    x2 = jax.random.normal(jax.random.PRNGKey(1), (B2, 10), jnp.float32)
    y2 = jax.block_until_ready(mlp_forward(x2, params))
    y2_ref = reference_forward(x2, params)
    assert y2.shape == (B2,), y2.shape
    assert jnp.allclose(y2, y2_ref, atol=1e-4, rtol=1e-4), "multi-tile mismatch"

    # bf16 fast path (per perf review: v6e / v7x only; skip on older gens).
    kind = jax.devices()[0].device_kind.lower()
    if not any(g in kind for g in ("v2", "v3", "v4", "v5")):
        y3 = jax.block_until_ready(mlp_forward(x2, params, use_bf16=True))
        assert jnp.allclose(y3, y2_ref, atol=3e-2, rtol=3e-2), "bf16 path mismatch"

    print("KERNEL_OK")
</pallas_src>

<mosaic_0001>
module attributes {stable_mosaic.version = 11 : i64} {
  func.func @mlp_kernel(%arg0: i32, %arg1: memref<128x10xf32, #tpu.memory_space<vmem>>, %arg2: memref<64x10xf32, #tpu.memory_space<vmem>>, %arg3: memref<64x1xf32, #tpu.memory_space<vmem>>, %arg4: memref<64x64xf32, #tpu.memory_space<vmem>>, %arg5: memref<64x1xf32, #tpu.memory_space<vmem>>, %arg6: memref<1x64xf32, #tpu.memory_space<vmem>>, %arg7: memref<1x1xf32, #tpu.memory_space<vmem>>, %arg8: memref<1x128xf32, #tpu.memory_space<vmem>>) attributes {dimension_semantics = [#tpu.dimension_semantics<parallel>], iteration_bounds = array<i64: 1>, scalar_prefetch = 0 : i64, scratch_operands = 0 : i64, tpu.core_type = #tpu.core_type<tc>, window_params = [{transform_indices = @transform_0, window_bounds = array<i64: 128, 10>}, {pipeline_mode = #tpu.pipeline_mode<synchronous>, transform_indices = @transform_1, window_bounds = array<i64: 64, 10>}, {pipeline_mode = #tpu.pipeline_mode<synchronous>, transform_indices = @transform_2, window_bounds = array<i64: 64, 1>}, {pipeline_mode = #tpu.pipeline_mode<synchronous>, transform_indices = @transform_3, window_bounds = array<i64: 64, 64>}, {pipeline_mode = #tpu.pipeline_mode<synchronous>, transform_indices = @transform_4, window_bounds = array<i64: 64, 1>}, {pipeline_mode = #tpu.pipeline_mode<synchronous>, transform_indices = @transform_5, window_bounds = array<i64: 1, 64>}, {pipeline_mode = #tpu.pipeline_mode<synchronous>, transform_indices = @transform_6, window_bounds = array<i64: 1, 1>}, {transform_indices = @transform_7, window_bounds = array<i64: 1, 128>}]} {
    %c0 = arith.constant 0 : index
    %c0_0 = arith.constant 0 : index
    %0 = vector.load %arg1[%c0, %c0_0] : memref<128x10xf32, #tpu.memory_space<vmem>>, vector<128x10xf32>
    %c0_1 = arith.constant 0 : index
    %c0_2 = arith.constant 0 : index
    %1 = vector.load %arg2[%c0_1, %c0_2] : memref<64x10xf32, #tpu.memory_space<vmem>>, vector<64x10xf32>
    %cst = arith.constant dense<0.000000e+00> : vector<64x128xf32>
    %2 = tpu.matmul %1, %0, %cst {dimension_numbers = #tpu.dot_dimension_numbers<[1], [1], [0], [0], [0, 0, 1, 0], [], []>, precision = #tpu.contract_precision<fp32>} : vector<64x10xf32>, vector<128x10xf32>, vector<64x128xf32> -> vector<64x128xf32>
    %c0_3 = arith.constant 0 : index
    %c0_4 = arith.constant 0 : index
    %3 = vector.load %arg3[%c0_3, %c0_4] : memref<64x1xf32, #tpu.memory_space<vmem>>, vector<64x1xf32>
    %4 = vector.broadcast %3 : vector<64x1xf32> to vector<64x128xf32>
    %5 = arith.addf %2, %4 : vector<64x128xf32>
    %cst_5 = arith.constant 0.000000e+00 : f32
    %6 = vector.broadcast %cst_5 : f32 to vector<64x128xf32>
    %7 = arith.cmpf ogt, %5, %6 : vector<64x128xf32>
    %cst_6 = arith.constant 0.000000e+00 : f32
    %8 = vector.broadcast %cst_6 : f32 to vector<64x128xf32>
    %9 = arith.minimumf %5, %8 : vector<64x128xf32>
    %10 = math.exp %9 : vector<64x128xf32>
    %cst_7 = arith.constant 1.000000e+00 : f32
    %11 = vector.broadcast %cst_7 : f32 to vector<64x128xf32>
    %12 = arith.subf %10, %11 : vector<64x128xf32>
    %13 = arith.select %7, %5, %12 : vector<64x128xi1>, vector<64x128xf32>
    %c0_8 = arith.constant 0 : index
    %c0_9 = arith.constant 0 : index
    %14 = vector.load %arg4[%c0_8, %c0_9] : memref<64x64xf32, #tpu.memory_space<vmem>>, vector<64x64xf32>
    %cst_10 = arith.constant dense<0.000000e+00> : vector<64x128xf32>
    %15 = tpu.matmul %14, %13, %cst_10 {dimension_numbers = #tpu.dot_dimension_numbers<[1], [0], [0], [1], [0, 0, 1, 1], [], []>, precision = #tpu.contract_precision<fp32>} : vector<64x64xf32>, vector<64x128xf32>, vector<64x128xf32> -> vector<64x128xf32>
    %c0_11 = arith.constant 0 : index
    %c0_12 = arith.constant 0 : index
    %16 = vector.load %arg5[%c0_11, %c0_12] : memref<64x1xf32, #tpu.memory_space<vmem>>, vector<64x1xf32>
    %17 = vector.broadcast %16 : vector<64x1xf32> to vector<64x128xf32>
    %18 = arith.addf %15, %17 : vector<64x128xf32>
    %cst_13 = arith.constant 0.000000e+00 : f32
    %19 = vector.broadcast %cst_13 : f32 to vector<64x128xf32>
    %20 = arith.cmpf ogt, %18, %19 : vector<64x128xf32>
    %cst_14 = arith.constant 0.000000e+00 : f32
    %21 = vector.broadcast %cst_14 : f32 to vector<64x128xf32>
    %22 = arith.minimumf %18, %21 : vector<64x128xf32>
    %23 = math.exp %22 : vector<64x128xf32>
    %cst_15 = arith.constant 1.000000e+00 : f32
    %24 = vector.broadcast %cst_15 : f32 to vector<64x128xf32>
    %25 = arith.subf %23, %24 : vector<64x128xf32>
    %26 = arith.select %20, %18, %25 : vector<64x128xi1>, vector<64x128xf32>
    %c0_16 = arith.constant 0 : index
    %c0_17 = arith.constant 0 : index
    %27 = vector.load %arg6[%c0_16, %c0_17] : memref<1x64xf32, #tpu.memory_space<vmem>>, vector<1x64xf32>
    %cst_18 = arith.constant dense<0.000000e+00> : vector<1x128xf32>
    %28 = tpu.matmul %27, %26, %cst_18 {dimension_numbers = #tpu.dot_dimension_numbers<[1], [0], [0], [1], [0, 0, 1, 1], [], []>, precision = #tpu.contract_precision<fp32>} : vector<1x64xf32>, vector<64x128xf32>, vector<1x128xf32> -> vector<1x128xf32>
    %c0_19 = arith.constant 0 : index
    %c0_20 = arith.constant 0 : index
    %29 = vector.load %arg7[%c0_19, %c0_20] : memref<1x1xf32, #tpu.memory_space<vmem>>, vector<1x1xf32>
    %30 = vector.broadcast %29 : vector<1x1xf32> to vector<1x128xf32>
    %31 = arith.addf %28, %30 : vector<1x128xf32>
    %c0_21 = arith.constant 0 : index
    %c0_22 = arith.constant 0 : index
    %32 = vector.load %arg8[%c0_21, %c0_22] : memref<1x128xf32, #tpu.memory_space<vmem>>, vector<1x128xf32>
    tpu.vector_store %arg8[%c0_21, %c0_22], %31 {strides = array<i32>} : memref<1x128xf32, #tpu.memory_space<vmem>>, vector<1x128xf32>,
    return
  }
  func.func @transform_0(%arg0: i32) -> (i32, i32) {
    %c0_i32 = arith.constant 0 : i32
    %c0_i32_0 = arith.constant 0 : i32
    return %arg0, %c0_i32 : i32, i32
  }
  func.func @transform_1(%arg0: i32) -> (i32, i32) {
    %c0_i32 = arith.constant 0 : i32
    %c0_i32_0 = arith.constant 0 : i32
    %c0_i32_1 = arith.constant 0 : i32
    return %c0_i32, %c0_i32_0 : i32, i32
  }
  func.func @transform_2(%arg0: i32) -> (i32, i32) {
    %c0_i32 = arith.constant 0 : i32
    %c0_i32_0 = arith.constant 0 : i32
    %c0_i32_1 = arith.constant 0 : i32
    return %c0_i32, %c0_i32_0 : i32, i32
  }
  func.func @transform_3(%arg0: i32) -> (i32, i32) {
    %c0_i32 = arith.constant 0 : i32
    %c0_i32_0 = arith.constant 0 : i32
    %c0_i32_1 = arith.constant 0 : i32
    return %c0_i32, %c0_i32_0 : i32, i32
  }
  func.func @transform_4(%arg0: i32) -> (i32, i32) {
    %c0_i32 = arith.constant 0 : i32
    %c0_i32_0 = arith.constant 0 : i32
    %c0_i32_1 = arith.constant 0 : i32
    return %c0_i32, %c0_i32_0 : i32, i32
  }
  func.func @transform_5(%arg0: i32) -> (i32, i32) {
    %c0_i32 = arith.constant 0 : i32
    %c0_i32_0 = arith.constant 0 : i32
    %c0_i32_1 = arith.constant 0 : i32
    return %c0_i32, %c0_i32_0 : i32, i32
  }
  func.func @transform_6(%arg0: i32) -> (i32, i32) {
    %c0_i32 = arith.constant 0 : i32
    %c0_i32_0 = arith.constant 0 : i32
    %c0_i32_1 = arith.constant 0 : i32
    return %c0_i32, %c0_i32_0 : i32, i32
  }
  func.func @transform_7(%arg0: i32) -> (i32, i32) {
    %c0_i32 = arith.constant 0 : i32
    %c0_i32_0 = arith.constant 0 : i32
    return %c0_i32, %arg0 : i32, i32
  }
}

</mosaic_0001>

<bundles_post_ra>
// kernel: tpu_custom_call.1
= control target key start
LH: loop header
LB: loop body
LE: loop exit
PB: predicated region body
PF: predicated region fallthrough
CT: control target
= control target key end

     0   :  { %s5057_s0 = inlined_call_operand.vmem [shape: f32[128,10], index: 0, kind: input, shape index: {}]   ;;  %s5058_s1 = inlined_call_operand.vmem [shape: f32[64,10], index: 1, kind: input, shape index: {}]   ;;  %s5059_s2 = inlined_call_operand.vmem [shape: f32[64,1], index: 2, kind: input, shape index: {}]   ;;  %s5060_s3 = inlined_call_operand.vmem [shape: f32[64,64], index: 3, kind: input, shape index: {}]   ;;  %s5061_s4 = inlined_call_operand.vmem [shape: f32[64,1], index: 4, kind: input, shape index: {}]   ;;  %s5062_s5 = inlined_call_operand.vmem [shape: f32[1,64], index: 5, kind: input, shape index: {}]   ;;  %s5063_s6 = inlined_call_operand.<no memory space> [shape: f32[1,1], index: 6, kind: input, shape index: {}]   ;;  %s5064_s7 = inlined_call_operand.hbm [shape: f32[1,128], index: 7, kind: output, shape index: {}]  }
   0x1   :  { %v12_v0 = vstv %s5063_s6 }
   0x2   :  { %13 = vst [vmem:[#allocation2] sm:$0x1] %v12_v0 }
   0x3   :  { %v29_v1 = vld [vmem:[%s5057_s0] sm:$0xff]  ;;  %v30_v2 = vld [vmem:[%s5057_s0 + $0x8] sm:$0xff]  ;;  %vm101_vm0 = vcmask 80896   ;;  %v31_v3 = vld [vmem:[%s5057_s0 + $0x10] sm:$0xff] }
   0x4   :  { %v127_v4 = vsel %vm101_vm0, %v29_v1, 0  ;;  %v130_v5 = vsel %vm101_vm0, %v30_v2, 0  ;;  %v32_v6 = vld [vmem:[%s5057_s0 + $0x18] sm:$0xff]  ;;  %v133_v7 = vsel %vm101_vm0, %v31_v3, 0  ;;  %v33_v8 = vld [vmem:[%s5057_s0 + $0x20] sm:$0xff]  ;;  %v34_v9 = vld [vmem:[%s5057_s0 + $0x28] sm:$0xff] }
   0x5   :  { %v175_v10 = vand.u32 4294901760, %v127_v4  ;;  %v178_v11 = vand.u32 4294901760, %v130_v5  ;;  %v136_v12 = vsel %vm101_vm0, %v32_v6, 0  ;;  %v181_v13 = vand.u32 4294901760, %v133_v7  ;;  %v35_v27 = vld [vmem:[%s5057_s0 + $0x30] sm:$0xff]  ;;  %v36_v28 = vld [vmem:[%s5057_s0 + $0x38] sm:$0xff] }
   0x6   :  { %v184_v14 = vand.u32 4294901760, %v136_v12  ;;  %v139_v15 = vsel %vm101_vm0, %v33_v8, 0  ;;  %v142_v16 = vsel %vm101_vm0, %v34_v9, 0 }
   0x7   :  { %v4154_v17 = vpack.c.bf16 %v178_v11, %v175_v10  ;;  %v4156_v18 = vsub.f32 %v127_v4, %v175_v10  ;;  %v4158_v19 = vsub.f32 %v130_v5, %v178_v11  ;;  %v4160_v20 = vsub.f32 %v133_v7, %v181_v13 }
   0x8   :  { %v4162_v21 = vpack.c.bf16 %v184_v14, %v181_v13  ;;  %v4164_v22 = vsub.f32 %v136_v12, %v184_v14  ;;  %v187_v24 = vand.u32 4294901760, %v139_v15  ;;  %v190_v25 = vand.u32 4294901760, %v142_v16 }
   0x9   :  { %v3617_v23 = vpack.c.bf16 %v4158_v19, %v4156_v18  ;;  %3554 = vmatprep.subr.bf16.mxu1 %v4154_v17 }
   0xa   :  { %v3621_v26 = vpack.c.bf16 %v4164_v22, %v4160_v20  ;;  %3556 = vmatpush3.bf16.xpose.msra.mxu1 %v4154_v17 }
   0xb   :  { %3618 = vmatprep.subr.bf16.mxu0 %v3617_v23  ;;  %3558 = vmatprep.subr.bf16.mxu1 %v4162_v21 }
   0xc   :  { %3620 = vmatpush3.bf16.xpose.msra.mxu0 %v3617_v23 }
   0xd   :  { %14 = vsyncpa [#allocation4], 0  ;;  %3622 = vmatprep.subr.bf16.mxu0 %v3621_v26  ;;  %v4179_v29 = vsub.f32 %v139_v15, %v187_v24  ;;  %v4181_v30 = vsub.f32 %v142_v16, %v190_v25  ;;  %v145_v31 = vsel %vm101_vm0, %v35_v27, 0  ;;  %v148_v32 = vsel %vm101_vm0, %v36_v28, 0  ;;  %v45_v33 = vld [vmem:[%s5058_s1] sm:$0xff]  ;;  %v38_v40 = vld [vmem:[%s5057_s0 + $0x48] sm:$0xff] }
   0xe   :  { %v4188_v34 = vpack.c.bf16 %v190_v25, %v187_v24  ;;  %v193_v36 = vand.u32 4294901760, %v145_v31  ;;  %v196_v37 = vand.u32 4294901760, %v148_v32  ;;  %v103_v38 = vsel %vm101_vm0, %v45_v33, 0  ;;  %v37_v39 = vld [vmem:[%s5057_s0 + $0x40] sm:$0xff]  ;;  %v39_v54 = vld [vmem:[%s5057_s0 + $0x50] sm:$0xff]  ;;  %v40_v55 = vld [vmem:[%s5057_s0 + $0x58] sm:$0xff] }
   0xf   :  { %v3625_v35 = vpack.c.bf16 %v4181_v30, %v4179_v29  ;;  %v4200_v41 = vand.u32 4294901760, %v103_v38  ;;  %v151_v45 = vsel %vm101_vm0, %v37_v39, 0  ;;  %v154_v46 = vsel %vm101_vm0, %v38_v40, 0  ;;  %v41_v12 = vld [vmem:[%s5057_s0 + $0x60] sm:$0xff]  ;;  %v42_v13 = vld [vmem:[%s5057_s0 + $0x68] sm:$0xff] }
  0x10   :  { %v4203_v42 = vsub.f32 %v145_v31, %v193_v36  ;;  %v4205_v43 = vsub.f32 %v148_v32, %v196_v37  ;;  %v4212_v47 = vpack.c.bf16 %v196_v37, %v193_v36  ;;  %v199_v49 = vand.u32 4294901760, %v151_v45  ;;  %v43_v36 = vld [vmem:[%s5057_s0 + $0x70] sm:$0xff]  ;;  %v44_v37 = vld [vmem:[%s5057_s0 + $0x78] sm:$0xff] }
  0x11   :  { %v4208_v44 = vsub.f32 %v103_v38, %v4200_v41  ;;  %v202_v50 = vand.u32 4294901760, %v154_v46  ;;  %v338_v52 = vand.u32 4294901760, %v4156_v18  ;;  %v345_v53 = vand.u32 4294901760, %v4158_v19 }
  0x12   :  { %3560 = vmatpush3.bf16.xpose.msra.mxu1 %v4162_v21  ;;  %v3629_v48 = vpack.c.bf16 %v4205_v43, %v4203_v42  ;;  %v352_v58 = vand.u32 4294901760, %v4160_v20  ;;  %v359_v59 = vand.u32 4294901760, %v4164_v22  ;;  %v4239_v60 = vsub.f32 %v151_v45, %v199_v49 }
  0x13   :  { %3562 = vmatprep.subr.bf16.mxu1 %v4188_v34  ;;  %3127 = vmatprep.mubr.f32.mxu0 %v4208_v44  ;;  %v5071_v51 = vand.u32 4294901760, %v4208_v44  ;;  %v4235_v57 = vpack.c.bf16 %v345_v53, %v338_v52  ;;  %v4241_v61 = vsub.f32 %v154_v46, %v202_v50  ;;  %v157_v63 = vsel %vm101_vm0, %v39_v54, 0 }
  0x14   :  { %3624 = vmatpush3.bf16.xpose.msra.mxu0 %v3621_v26  ;;  %v160_v0 = vsel %vm101_vm0, %v40_v55, 0  ;;  %v4249_v1 = vpack.c.bf16 %v359_v59, %v352_v58  ;;  %v4251_v2 = vpack.c.bf16 %v202_v50, %v199_v49  ;;  %v366_v3 = vand.u32 4294901760, %v4179_v29  ;;  %v46_v49 = vld [vmem:[%s5058_s1 + $0x8] sm:$0xff] }
  0x15   :  { %3626 = vmatprep.subr.bf16.mxu0 %v3625_v35  ;;  %v258_v56 = vsub.f32 %v4208_v44, %v5071_v51  ;;  %v373_v4 = vand.u32 4294901760, %v4181_v30  ;;  %v380_v5 = vand.u32 4294901760, %v4203_v42  ;;  %v387_v6 = vand.u32 4294901760, %v4205_v43 }
  0x16   :  { %v3633_v7 = vpack.c.bf16 %v4241_v61, %v4239_v60  ;;  %v205_v8 = vand.u32 4294901760, %v157_v63  ;;  %v208_v9 = vand.u32 4294901760, %v160_v0  ;;  %v5075_v14 = vand.u32 4294901760, %v4239_v60 }
  0x17   :  { %v259_v62 = vand.u32 4294901760, %v258_v56  ;;  %v4263_v10 = vpack.c.bf16 %v373_v4, %v366_v3  ;;  %v4270_v11 = vpack.c.bf16 %v387_v6, %v380_v5  ;;  %v5074_v15 = vand.u32 4294901760, %v4241_v61  ;;  %v47_v56 = vld [vmem:[%s5058_s1 + $0x10] sm:$0xff] }
  0x18   :  { %v4281_v16 = vsub.f32 %v157_v63, %v205_v8  ;;  %v4283_v23 = vsub.f32 %v160_v0, %v208_v9  ;;  %v163_v25 = vsel %vm101_vm0, %v41_v12, 0  ;;  %v166_v26 = vsel %vm101_vm0, %v42_v13, 0 }
  0x19   :  { %3039 = vmatprep.mubr.f32.mxu1 %v259_v62  ;;  %v4289_v24 = vpack.c.bf16 %v5074_v15, %v5075_v14  ;;  %v4293_v27 = vpack.c.bf16 %v208_v9, %v205_v8  ;;  %v211_v31 = vand.u32 4294901760, %v163_v25  ;;  %v214_v32 = vand.u32 4294901760, %v166_v26 }
  0x1a   :  { %3564 = vmatpush3.bf16.xpose.msra.mxu1 %v4188_v34  ;;  %v3637_v28 = vpack.c.bf16 %v4283_v23, %v4281_v16  ;;  %v5070_v33 = vand.u32 4294901760, %v4281_v16  ;;  %v169_v45 = vsel %vm101_vm0, %v43_v36, 0  ;;  %v172_v46 = vsel %vm101_vm0, %v44_v37, 0 }
  0x1b   :  { %3566 = vmatprep.subr.bf16.mxu1 %v4212_v47  ;;  %v4313_v39 = vsub.f32 %v163_v25, %v211_v31  ;;  %v4315_v40 = vsub.f32 %v166_v26, %v214_v32  ;;  %v217_v54 = vand.u32 4294901760, %v169_v45  ;;  %v220_v55 = vand.u32 4294901760, %v172_v46  ;;  %v49_v26 = vld [vmem:[%s5058_s1 + $0x20] sm:$0xff] }
  0x1c   :  { %3628 = vmatpush3.bf16.xpose.msra.mxu0 %v3625_v35  ;;  %v5067_v35 = vand.u32 4294901760, %v4283_v23  ;;  %v106_v0 = vsel %vm101_vm0, %v46_v49, 0  ;;  %v109_v13 = vsel %vm101_vm0, %v47_v56, 0  ;;  %v346_v36 = vsub.f32 %v4158_v19, %v345_v53  ;;  %v50_v49 = vld [vmem:[%s5058_s1 + $0x28] sm:$0xff] }
  0x1d   :  { %3630 = vmatprep.subr.bf16.mxu0 %v3629_v48  ;;  %v3641_v50 = vpack.c.bf16 %v4315_v40, %v4313_v39  ;;  %v5066_v62 = vand.u32 4294901760, %v4313_v39  ;;  %v5065_v63 = vand.u32 4294901760, %v4315_v40  ;;  %v4343_v9 = vsub.f32 %v169_v45, %v217_v54 }
  0x1e   :  { %v4311_v38 = vpack.c.bf16 %v5067_v35, %v5070_v33  ;;  %v4345_v12 = vsub.f32 %v172_v46, %v220_v55  ;;  %v4348_v25 = vand.u32 4294901760, %v106_v0  ;;  %v4362_v37 = vand.u32 4294901760, %v109_v13 }
  0x1f   :  { %v4341_v8 = vpack.c.bf16 %v5065_v63, %v5066_v62  ;;  %v115_v46 = vsel %vm101_vm0, %v49_v26, 0  ;;  %v5069_v19 = vand.u32 4294901760, %v4343_v9  ;;  %v347_v56 = vand.u32 4294901760, %v346_v36 }
  0x20   :  { %v3645_v45 = vpack.c.bf16 %v4345_v12, %v4343_v9  ;;  %v4379_v53 = vsub.f32 %v106_v0, %v4348_v25  ;;  %v4385_v26 = vand.u32 4294901760, %v115_v46  ;;  %v118_v63 = vsel %vm101_vm0, %v50_v49, 0 }
  0x21   :  { %v4403_v49 = vand.u32 4294901760, %v118_v63  ;;  %vm1220_vm1 = vcmask 523264   ;;  %vm4084_vm10 = vmmov 0  }
  0x22   :  { %3568 = vmatpush3.bf16.xpose.msra.mxu1 %v4212_v47 }
  0x23   :  { %3570 = vmatprep.subr.bf16.mxu1 %v4251_v2 }
  0x24   :  { %3632 = vmatpush3.bf16.xpose.msra.mxu0 %v3629_v48  ;;  %v4319_v48 = vpack.c.bf16 %v214_v32, %v211_v31  ;;  %v339_v32 = vsub.f32 %v4156_v18, %v338_v52  ;;  %v51_v18 = vld [vmem:[%s5058_s1 + $0x30] sm:$0xff]  ;;  %v5068_v52 = vand.u32 4294901760, %v4345_v12 }
  0x25   :  { %3634 = vmatprep.subr.bf16.mxu0 %v3633_v7  ;;  %v121_v0 = vsel %vm101_vm0, %v51_v18, 0  ;;  %v360_v18 = vsub.f32 %v4164_v22, %v359_v59 }
  0x26   :  { %v4392_v62 = vpack.c.bf16 %v5068_v52, %v5069_v19  ;;  %v353_v52 = vsub.f32 %v4160_v20, %v352_v58  ;;  %v4412_v19 = vsub.f32 %v115_v46, %v4385_v26  ;;  %v4414_v33 = vand.u32 4294901760, %v121_v0 }
  0x27   :  { %v4427_v58 = vsub.f32 %v118_v63, %v4403_v49 }
  0x28   :  { %v5076_v22 = vand.u32 4294901760, %v4412_v19  ;;  %v354_v46 = vand.u32 4294901760, %v353_v52 }
  0x29   :  { %v307_v15 = vand.u32 4294901760, %v4427_v58 }
  0x2a   :  { %3572 = vmatpush3.bf16.xpose.msra.mxu1 %v4251_v2  ;;  %v298_v14 = vsub.f32 %v4412_v19, %v5076_v22 }
  0x2b   :  { %3574 = vmatprep.subr.bf16.mxu1 %v4293_v27  ;;  %v308_v22 = vsub.f32 %v4427_v58, %v307_v15 }
  0x2c   :  { %3636 = vmatpush3.bf16.xpose.msra.mxu0 %v3633_v7  ;;  %v48_v7 = vld [vmem:[%s5058_s1 + $0x18] sm:$0xff] }
  0x2d   :  { %3638 = vmatprep.subr.bf16.mxu0 %v3637_v28  ;;  %v112_v31 = vsel %vm101_vm0, %v48_v7, 0  ;;  %v4383_v7 = vsub.f32 %v109_v13, %v4362_v37  ;;  %v5072_v13 = vand.u32 4294901760, %v4379_v53 }
  0x2f   :  { %v5073_v36 = vand.u32 4294901760, %v4383_v7  ;;  %v268_v51 = vsub.f32 %v4379_v53, %v5072_v13 }
  0x31   :  { %v278_v20 = vsub.f32 %v4383_v7, %v5073_v36  ;;  %v269_v13 = vand.u32 4294901760, %v268_v51  ;;  %v367_v51 = vsub.f32 %v4179_v29, %v366_v3  ;;  %v309_v3 = vand.u32 4294901760, %v308_v22 }
  0x32   :  { %3576 = vmatpush3.bf16.xpose.msra.mxu1 %v4293_v27 }
  0x33   :  { %3578 = vmatprep.subr.bf16.mxu1 %v4319_v48  ;;  %v279_v63 = vand.u32 4294901760, %v278_v20  ;;  %v368_v29 = vand.u32 4294901760, %v367_v51  ;;  %v5080_v51 = vand.u32 4294901760, %v4208_v44 }
  0x34   :  { %3640 = vmatpush3.bf16.xpose.msra.mxu0 %v3637_v28  ;;  %v4353_v28 = vpack.c.bf16 %v220_v55, %v217_v54  ;;  %v4371_v54 = vand.u32 4294901760, %v112_v31  ;;  %v340_v55 = vand.u32 4294901760, %v339_v32 }
  0x35   :  { %3642 = vmatprep.subr.bf16.mxu0 %v3641_v50 }
  0x36   :  { %v4400_v32 = vsub.f32 %v112_v31, %v4371_v54  ;;  %v3585_v35 = vpack.c.bf16 %v347_v56, %v340_v55  ;;  %v361_v56 = vand.u32 4294901760, %v360_v18  ;;  %v374_v18 = vsub.f32 %v4181_v30, %v373_v4 }
  0x38   :  { %v5077_v55 = vand.u32 4294901760, %v4400_v32  ;;  %v375_v30 = vand.u32 4294901760, %v374_v18 }
  0x3a   :  { %3580 = vmatpush3.bf16.xpose.msra.mxu1 %v4319_v48  ;;  %v288_v36 = vsub.f32 %v4400_v32, %v5077_v55 }
  0x3b   :  { %3582 = vmatprep.subr.bf16.mxu1 %v4353_v28 }
  0x3c   :  { %3644 = vmatpush3.bf16.xpose.msra.mxu0 %v3641_v50  ;;  %v52_v50 = vld [vmem:[%s5058_s1 + $0x38] sm:$0xff]  ;;  %v289_v20 = vand.u32 4294901760, %v288_v36  ;;  %v388_v36 = vsub.f32 %v4205_v43, %v387_v6  ;;  %v5078_v43 = vand.u32 4294901760, %v4239_v60  ;;  %v5079_v6 = vand.u32 4294901760, %v4241_v61 }
  0x3d   :  { %3646 = vmatprep.subr.bf16.mxu0 %v3645_v45  ;;  %v124_v31 = vsel %vm101_vm0, %v52_v50, 0  ;;  %v4432_v50 = vsub.f32 %v121_v0, %v4414_v33  ;;  %v3589_v0 = vpack.c.bf16 %v361_v56, %v354_v46 }
  0x3e   :  { %v4429_v59 = vand.u32 4294901760, %v124_v31 }
  0x3f   :  { %v317_v52 = vand.u32 4294901760, %v4432_v50 }
  0x41   :  { %v318_v46 = vsub.f32 %v4432_v50, %v317_v52 }
  0x42   :  { %3584 = vmatpush3.bf16.xpose.msra.mxu1 %v4353_v28 }
  0x43   :  { %3586 = vmatprep.subr.bf16.mxu1 %v3585_v35 }
  0x44   :  { %3648 = vmatpush3.bf16.xpose.msra.mxu0 %v3645_v45  ;;  %v4444_v45 = vsub.f32 %v124_v31, %v4429_v59  ;;  %v299_v31 = vand.u32 4294901760, %v298_v14  ;;  %v319_v14 = vand.u32 4294901760, %v318_v46  ;;  %v5081_v46 = vand.u32 4294901760, %v4281_v16 }
  0x45   :  { %3650 = vmatprep.subr.bf16.mxu0 %v4154_v17 }
  0x46   :  { %v327_v55 = vand.u32 4294901760, %v4444_v45 }
  0x48   :  { %v328_v4 = vsub.f32 %v4444_v45, %v327_v55 }
  0x49   :  { %3040 = vmatmul.mubr.f32.vlgmr.msra.gmra.mrb[0].mxu1 %v269_v13  ;;  %v381_v13 = vsub.f32 %v4203_v42, %v380_v5  ;;  %v395_v5 = vsub.f32 %v4239_v60, %v5078_v43  ;;  %v409_v60 = vsub.f32 %v4281_v16, %v5081_v46 }
  0x4a   :  { %3588 = vmatpush3.bf16.xpose.msra.mxu1 %v3585_v35  ;;  %3042 = vmatprep.mubr.f32.mxu1 %v279_v63  ;;  %v3593_v35 = vpack.c.bf16 %v375_v30, %v368_v29  ;;  %v329_v22 = vand.u32 4294901760, %v328_v4  ;;  %v389_v63 = vand.u32 4294901760, %v388_v36  ;;  %v5082_v29 = vand.u32 4294901760, %v4283_v23 }
  0x4b   :  { %3128 = vmatmul.mubr.f32.vlgmr.msra.gmra.mrb[0].mxu0 %v4379_v53  ;;  %3590 = vmatprep.subr.bf16.mxu1 %v3589_v0  ;;  %v382_v56 = vand.u32 4294901760, %v381_v13  ;;  %v396_v18 = vand.u32 4294901760, %v395_v5  ;;  %v410_v44 = vand.u32 4294901760, %v409_v60  ;;  %v5083_v4 = vand.u32 4294901760, %v4313_v39  ;;  %v1166_v60 = vld [vmem:[%s5060_s3 + $0x10] sm:$0xff] }
  0x4c   :  { %3652 = vmatpush3.bf16.xpose.msra.mxu0 %v4154_v17  ;;  %3130 = vmatprep.mubr.f32.mxu0 %v4383_v7  ;;  %v5089_v5 = vand.u32 4294901760, %v4400_v32 }
  0x4d   :  { %3654 = vmatprep.subr.bf16.mxu0 %v4162_v21  ;;  %3043 = vmatmul.mubr.f32.gmra.mrb[2].mxu1 %v289_v20  ;;  %v3597_v42 = vpack.c.bf16 %v389_v63, %v382_v56  ;;  %v5086_v63 = vand.u32 4294901760, %v4345_v12 }
  0x4e   :  { %3045 = vmatprep.mubr.f32.mxu1 %v299_v31 }
  0x4f   :  { %3131 = vmatmul.mubr.f32.gmra.mrb[2].mxu0 %v4400_v32  ;;  %v58_v32 = vld [vmem:[%s5059_s2 + $0x28] sm:$0xff] }
  0x50   :  { %3133 = vmatprep.mubr.f32.mxu0 %v4412_v19 }
  0x51   :  { %3046 = vmatmul.mubr.f32.gmra.mrb[4].mxu1 %v309_v3 }
  0x52   :  { %3592 = vmatpush3.bf16.xpose.msra.mxu1 %v3589_v0  ;;  %3048 = vmatprep.mubr.f32.mxu1 %v319_v14  ;;  %v402_v0 = vsub.f32 %v4241_v61, %v5079_v6  ;;  %v416_v61 = vsub.f32 %v4283_v23, %v5082_v29  ;;  %v423_v14 = vsub.f32 %v4313_v39, %v5083_v4  ;;  %v5090_v6 = vand.u32 4294901760, %v4412_v19  ;;  %v54_v19 = vld [vmem:[%s5059_s2 + $0x8] sm:$0xff]  ;;  %v1167_v4 = vld [vmem:[%s5060_s3 + $0x18] sm:$0xff] }
  0x53   :  { %3134 = vmatmul.mubr.f32.gmra.mrb[4].mxu0 %v4427_v58  ;;  %3594 = vmatprep.subr.bf16.mxu1 %v3593_v35  ;;  %v444_v39 = vsub.f32 %v4345_v12, %v5086_v63  ;;  %v5088_v12 = vand.u32 4294901760, %v4383_v7  ;;  %v57_v7 = vld [vmem:[%s5059_s2 + $0x20] sm:$0xff] }
  0x54   :  { %3656 = vmatpush3.bf16.xpose.msra.mxu0 %v4162_v21  ;;  %3136 = vmatprep.mubr.f32.mxu0 %v4432_v50  ;;  %v403_v20 = vand.u32 4294901760, %v402_v0  ;;  %v417_v30 = vand.u32 4294901760, %v416_v61  ;;  %v424_v23 = vand.u32 4294901760, %v423_v14  ;;  %v1172_v58 = vld [vmem:[%s5061_s4] sm:$0xff]  ;;  %v1173_v50 = vld [vmem:[%s5061_s4 + $0x8] sm:$0xff] }
  0x55   :  { %3658 = vmatprep.subr.bf16.mxu0 %v4188_v34  ;;  %3049 = vmatmul.mubr.f32.gmra.mrb[6].mxu1 %v329_v22  ;;  %v5085_v22 = vand.u32 4294901760, %v4343_v9  ;;  %v1177_v0 = vld [vmem:[%s5061_s4 + $0x28] sm:$0xff] }
  0x56   :  { %3083 = vmatprep.mubr.f32.mxu1 %v4200_v41  ;;  %v3601_v31 = vpack.c.bf16 %v403_v20, %v396_v18  ;;  %v3605_v3 = vpack.c.bf16 %v417_v30, %v410_v44  ;;  %v2132_v18 = vld [vmem:[#allocation2] sm:$0x1] }
  0x57   :  { %3137 = vmatmul.mubr.f32.gmra.mrb[6].mxu0 %v4444_v45  ;;  %v437_v56 = vsub.f32 %v4343_v9, %v5085_v22  ;;  %v5087_v9 = vand.u32 4294901760, %v4379_v53  ;;  %v56_v53 = vld [vmem:[%s5059_s2 + $0x18] sm:$0xff]  ;;  %v1176_v45 = vld [vmem:[%s5061_s4 + $0x20] sm:$0xff] }
  0x58   :  { %3171 = vmatprep.mubr.f32.mxu0 %v5080_v51  ;;  %v1178_v51 = vld [vmem:[%s5061_s4 + $0x30] sm:$0xff] }
  0x5a   :  { %3596 = vmatpush3.bf16.xpose.msra.mxu1 %v3593_v35  ;;  %v5084_v35 = vand.u32 4294901760, %v4315_v40 }
  0x5b   :  { %3598 = vmatprep.subr.bf16.mxu1 %v3597_v42 }
  0x5c   :  { %3660 = vmatpush3.bf16.xpose.msra.mxu0 %v4188_v34  ;;  %v430_v16 = vsub.f32 %v4315_v40, %v5084_v35  ;;  %v438_v40 = vand.u32 4294901760, %v437_v56  ;;  %v1228_v35 = vsel %vm1220_vm1, %v1166_v60, 0 }
  0x5d   :  { %3662 = vmatprep.subr.bf16.mxu0 %v4212_v47 }
  0x5e   :  { %v431_v13 = vand.u32 4294901760, %v430_v16 }
  0x60   :  { %v3609_v36 = vpack.c.bf16 %v431_v13, %v424_v23 }
  0x62   :  { %3600 = vmatpush3.bf16.xpose.msra.mxu1 %v3597_v42  ;;  %v445_v42 = vand.u32 4294901760, %v444_v39 }
  0x63   :  { %3602 = vmatprep.subr.bf16.mxu1 %v3601_v31 }
  0x64   :  { %3664 = vmatpush3.bf16.xpose.msra.mxu0 %v4212_v47  ;;  %v3613_v43 = vpack.c.bf16 %v445_v42, %v438_v40  ;;  %v1231_v40 = vsel %vm1220_vm1, %v1167_v4, 0 }
  0x65   :  { %3666 = vmatprep.subr.bf16.mxu0 %v4251_v2 }
  0x6a   :  { %3604 = vmatpush3.bf16.xpose.msra.mxu1 %v3601_v31 }
  0x6b   :  { %3606 = vmatprep.subr.bf16.mxu1 %v3605_v3 }
  0x6c   :  { %3668 = vmatpush3.bf16.xpose.msra.mxu0 %v4251_v2 }
  0x6d   :  { %3670 = vmatprep.subr.bf16.mxu0 %v4293_v27 }
  0x72   :  { %3608 = vmatpush3.bf16.xpose.msra.mxu1 %v3605_v3 }
  0x73   :  { %3610 = vmatprep.subr.bf16.mxu1 %v3609_v36 }
  0x74   :  { %3672 = vmatpush3.bf16.xpose.msra.mxu0 %v4293_v27 }
  0x75   :  { %3674 = vmatprep.subr.bf16.mxu0 %v4319_v48 }
  0x7a   :  { %3612 = vmatpush3.bf16.xpose.msra.mxu1 %v3609_v36 }
  0x7b   :  { %3614 = vmatprep.subr.bf16.mxu1 %v3613_v43 }
  0x7c   :  { %3676 = vmatpush3.bf16.xpose.msra.mxu0 %v4319_v48 }
  0x7d   :  { %3678 = vmatprep.subr.bf16.mxu0 %v4353_v28 }
  0x82   :  { %3616 = vmatpush3.bf16.xpose.msra.mxu1 %v3613_v43 }
  0x84   :  { %3680 = vmatpush3.bf16.xpose.msra.mxu0 %v4353_v28 }
  0x85   :  { %3682 = vmatprep.subr.bf16.mxu0 %v4235_v57 }
  0x89   :  { %3084 = vmatmul.mubr.f32.vlgmr.msra.gmra.mrb[0].mxu1 %v4348_v25 }
  0x8a   :  { %3086 = vmatprep.mubr.f32.mxu1 %v4362_v37 }
  0x8b   :  { %3172 = vmatmul.mubr.f32.vlgmr.msra.gmra.mrb[0].mxu0 %v5087_v9 }
  0x8c   :  { %3684 = vmatpush3.bf16.xpose.msra.mxu0 %v4235_v57  ;;  %3174 = vmatprep.mubr.f32.mxu0 %v5088_v12  ;;  %v53_v57 = vld [vmem:[%s5059_s2] sm:$0xff]  ;;  %v4675_v12 = vand.u32 4294901760, %v1228_v35 }
  0x8d   :  { %3686 = vmatprep.subr.bf16.mxu0 %v4249_v1  ;;  %3087 = vmatmul.mubr.f32.gmra.mrb[2].mxu1 %v4371_v54 }
  0x8e   :  { %3089 = vmatprep.mubr.f32.mxu1 %v4385_v26 }
  0x8f   :  { %3175 = vmatmul.mubr.f32.gmra.mrb[2].mxu0 %v5089_v5 }
  0x90   :  { %3177 = vmatprep.mubr.f32.mxu0 %v5090_v6 }
  0x91   :  { %3090 = vmatmul.mubr.f32.gmra.mrb[4].mxu1 %v4403_v49 }
  0x92   :  { %3092 = vmatprep.mubr.f32.mxu1 %v4414_v33 }
  0x93   :  { %3178 = vmatmul.mubr.f32.gmra.mrb[4].mxu0 %v307_v15  ;;  %v55_v15 = vld [vmem:[%s5059_s2 + $0x10] sm:$0xff] }
  0x94   :  { %3688 = vmatpush3.bf16.xpose.msra.mxu0 %v4249_v1  ;;  %3180 = vmatprep.mubr.f32.mxu0 %v317_v52  ;;  %v4082_v1 = vmov 0   ;;  %v1174_v52 = vld [vmem:[%s5061_s4 + $0x10] sm:$0xff] }
  0x95   :  { %3690 = vmatprep.subr.bf16.mxu0 %v4263_v10  ;;  %3093 = vmatmul.mubr.f32.gmra.mrb[6].mxu1 %v4429_v59 }
  0x96   :  { %4024 = vset.pattern.permute.xlu0 %v4082_v1  ;;  %4025 = vset.pattern.permute.xlu1 %v4082_v1 }
  0x97   :  { %3181 = vmatmul.mubr.f32.gmra.mrb[6].mxu0 %v327_v55  ;;  %63 = vperm.xlu0 %4024, %v53_v57   ;;  %v59_v55 = vld [vmem:[%s5059_s2 + $0x30] sm:$0xff]  ;;  %v1168_v57 = vld [vmem:[%s5060_s3 + $0x20] sm:$0xff] }
  0x98   :  { %3215 = vmatprep.mubr.f32.mxu0 %v4200_v41  ;;  %73 = vperm.xlu1 %4025, %v55_v15  }
  0x9b   :  { %68 = vperm.xlu0 %4024, %v54_v19   ;;  %v4683_v19 = vand.u32 4294901760, %v1231_v40 }
  0x9c   :  { %3692 = vmatpush3.bf16.xpose.msra.mxu0 %v4263_v10  ;;  %78 = vperm.xlu1 %4025, %v56_v53   ;;  %v60_v10 = vld [vmem:[%s5059_s2 + $0x38] sm:$0xff]  ;;  %v1169_v53 = vld [vmem:[%s5060_s3 + $0x28] sm:$0xff] }
  0x9d   :  { %3694 = vmatprep.subr.bf16.mxu0 %v4270_v11 }
  0x9f   :  { %83 = vperm.xlu0 %4024, %v57_v7  }
  0xa0   :  { %88 = vperm.xlu1 %4025, %v58_v32  }
  0xa3   :  { %93 = vperm.xlu0 %4024, %v59_v55  }
  0xa4   :  { %3696 = vmatpush3.bf16.xpose.msra.mxu0 %v4270_v11  ;;  %98 = vperm.xlu1 %4025, %v60_v10   ;;  %v1175_v11 = vld [vmem:[%s5061_s4 + $0x18] sm:$0xff] }
  0xa5   :  { %3698 = vmatprep.subr.bf16.mxu0 %v4289_v24 }
  0xa7   :  { %1182 = vperm.xlu0 %4024, %v1172_v58  }
  0xa8   :  { %1187 = vperm.xlu1 %4025, %v1173_v50  }
  0xab   :  { %1192 = vperm.xlu0 %4024, %v1174_v52  }
  0xac   :  { %3700 = vmatpush3.bf16.xpose.msra.mxu0 %v4289_v24  ;;  %1197 = vperm.xlu1 %4025, %v1175_v11   ;;  %v1179_v24 = vld [vmem:[%s5061_s4 + $0x38] sm:$0xff] }
  0xad   :  { %3702 = vmatprep.subr.bf16.mxu0 %v4311_v38 }
  0xaf   :  { %1202 = vperm.xlu0 %4024, %v1176_v45   ;;  %v4693_v45 = vsub.f32 %v1228_v35, %v4675_v12 }
  0xb0   :  { %1207 = vperm.xlu1 %4025, %v1177_v0   ;;  %v1234_v0 = vsel %vm1220_vm1, %v1168_v57, 0 }
  0xb3   :  { %1212 = vperm.xlu0 %4024, %v1178_v51  }
  0xb4   :  { %3704 = vmatpush3.bf16.xpose.msra.mxu0 %v4311_v38  ;;  %1217 = vperm.xlu1 %4025, %v1179_v24  }
  0xb5   :  { %3706 = vmatprep.subr.bf16.mxu0 %v4341_v8 }
  0xb7   :  { %2135 = vperm.xlu0 %4024, %v2132_v18  }
  0xbc   :  { %3708 = vmatpush3.bf16.xpose.msra.mxu0 %v4341_v8 }
  0xbd   :  { %3710 = vmatprep.subr.bf16.mxu0 %v4392_v62 }
  0xc4   :  { %3712 = vmatpush3.bf16.xpose.msra.mxu0 %v4392_v62 }
  0xc5   :  { %3714 = vmatprep.subr.bf16.mxu0 %v4154_v17 }
  0xcb   :  { %3216 = vmatmul.mubr.f32.vlgmr.msra.gmra.mrb[0].mxu0 %v4348_v25 }
  0xcc   :  { %3716 = vmatpush3.bf16.xpose.msra.mxu0 %v4154_v17  ;;  %3218 = vmatprep.mubr.f32.mxu0 %v4362_v37 }
  0xcd   :  { %3718 = vmatprep.subr.bf16.mxu0 %v4162_v21 }
  0xcf   :  { %3219 = vmatmul.mubr.f32.gmra.mrb[2].mxu0 %v4371_v54 }
  0xd0   :  { %3221 = vmatprep.mubr.f32.mxu0 %v4385_v26 }
  0xd3   :  { %3222 = vmatmul.mubr.f32.gmra.mrb[4].mxu0 %v4403_v49 }
  0xd4   :  { %3720 = vmatpush3.bf16.xpose.msra.mxu0 %v4162_v21  ;;  %3224 = vmatprep.mubr.f32.mxu0 %v4414_v33 }
  0xd5   :  { %3722 = vmatprep.subr.bf16.mxu0 %v4188_v34 }
  0xd7   :  { %3225 = vmatmul.mubr.f32.gmra.mrb[6].mxu0 %v4429_v59 }
  0xd8   :  { %3259 = vmatprep.mubr.f32.mxu0 %v4200_v41 }
  0xdc   :  { %3724 = vmatpush3.bf16.xpose.msra.mxu0 %v4188_v34 }
  0xdd   :  { %3726 = vmatprep.subr.bf16.mxu0 %v4212_v47 }
  0xe4   :  { %3728 = vmatpush3.bf16.xpose.msra.mxu0 %v4212_v47 }
  0xe5   :  { %3730 = vmatprep.subr.bf16.mxu0 %v4251_v2 }
  0xec   :  { %3732 = vmatpush3.bf16.xpose.msra.mxu0 %v4251_v2 }
  0xed   :  { %3734 = vmatprep.subr.bf16.mxu0 %v4293_v27 }
  0xf4   :  { %3736 = vmatpush3.bf16.xpose.msra.mxu0 %v4293_v27 }
  0xf5   :  { %3738 = vmatprep.subr.bf16.mxu0 %v4319_v48 }
  0xfc   :  { %3740 = vmatpush3.bf16.xpose.msra.mxu0 %v4319_v48  ;;  %v1164_v48 = vld [vmem:[%s5060_s3] sm:$0xff] }
  0xfd   :  { %3742 = vmatprep.subr.bf16.mxu0 %v4353_v28  ;;  %v1222_v62 = vsel %vm1220_vm1, %v1164_v48, 0 }
  0xfe   :  { %v4640_v8 = vand.u32 4294901760, %v1222_v62 }
 0x100   :  { %3315 = vmatprep.mubr.f32.mxu1 %v4640_v8 }
 0x104   :  { %3744 = vmatpush3.bf16.xpose.msra.mxu0 %v4353_v28 }
 0x10b   :  { %3260 = vmatmul.mubr.f32.vlgmr.msra.gmra.mrb[0].mxu0 %v4348_v25 }
 0x10c   :  { %3262 = vmatprep.mubr.f32.mxu0 %v4362_v37 }
 0x10f   :  { %3263 = vmatmul.mubr.f32.gmra.mrb[2].mxu0 %v4371_v54 }
 0x110   :  { %3265 = vmatprep.mubr.f32.mxu0 %v4385_v26 }
 0x113   :  { %3266 = vmatmul.mubr.f32.gmra.mrb[4].mxu0 %v4403_v49  ;;  %v1165_v49 = vld [vmem:[%s5060_s3 + $0x8] sm:$0xff] }
 0x114   :  { %3268 = vmatprep.mubr.f32.mxu0 %v4414_v33  ;;  %v4643_v33 = vsub.f32 %v1222_v62, %v4640_v8  ;;  %v1225_v31 = vsel %vm1220_vm1, %v1165_v49, 0  ;;  %v4710_v62 = vand.u32 4294901760, %v1234_v0 }
 0x115   :  { %v4657_v44 = vand.u32 4294901760, %v1225_v31 }
 0x116   :  { %v1320_v25 = vand.u32 4294901760, %v4643_v33  ;;  %v64_v54 = vpop.permute.xlu0 %63 }
 0x117   :  { %3269 = vmatmul.mubr.f32.gmra.mrb[6].mxu0 %v4429_v59  ;;  %v74_v26 = vpop.permute.xlu1 %73  ;;  %v4670_v39 = vsub.f32 %v1225_v31, %v4657_v44 }
 0x118   :  { %v1321_v28 = vsub.f32 %v4643_v33, %v1320_v25 }
 0x119   :  { %v1330_v10 = vand.u32 4294901760, %v4670_v39 }
 0x11a   :  { %v1322_v37 = vand.u32 4294901760, %v1321_v28  ;;  %v69_v59 = vpop.permute.xlu0 %68 }
 0x11b   :  { %v79_v20 = vpop.permute.xlu1 %78 }
 0x11c   :  { %3287 = vmatprep.mubr.f32.mxu0 %v1322_v37 }
 0x11e   :  { %v84_v36 = vpop.permute.xlu0 %83 }
 0x11f   :  { %v89_v16 = vpop.permute.xlu1 %88 }
 0x122   :  { %v94_v51 = vpop.permute.xlu0 %93 }
 0x123   :  { %v99_v58 = vpop.permute.xlu1 %98 }
 0x15c   :  { %v3085_v17 = vpop.f32.mrb[0].mxu1 }
 0x15d   :  { %v482_v21 = vpop.f32.mrb[1].mxu1  ;;  %v3913_v46 = vadd.f32 %v3085_v17, %v69_v59 }
 0x15e   :  { %v3915_v29 = vadd.f32 %v482_v21, %v64_v54  ;;  %v1237_v21 = vsel %vm1220_vm1, %v1169_v53, 0 }
 0x15f   :  { %v4718_v49 = vand.u32 4294901760, %v1237_v21 }
 0x160   :  { %v3088_v34 = vpop.f32.mrb[2].mxu1 }
 0x161   :  { %v494_v41 = vpop.f32.mrb[3].mxu1  ;;  %v3917_v23 = vadd.f32 %v3088_v34, %v79_v20 }
 0x162   :  { %v3919_v22 = vadd.f32 %v494_v41, %v74_v26  ;;  %v1340_v26 = vand.u32 4294901760, %v4693_v45 }
 0x164   :  { %v3091_v47 = vpop.f32.mrb[4].mxu1 }
 0x165   :  { %v506_v2 = vpop.f32.mrb[5].mxu1  ;;  %v3921_v15 = vadd.f32 %v3091_v47, %v89_v16  ;;  %v4702_v47 = vsub.f32 %v1231_v40, %v4683_v19 }
 0x166   :  { %v3923_v7 = vadd.f32 %v506_v2, %v84_v36 }
 0x168   :  { %v3094_v27 = vpop.f32.mrb[6].mxu1 }
 0x169   :  { %v4634_v38 = vpop.f32.mrb[7].mxu1  ;;  %v3925_v24 = vadd.f32 %v3094_v27, %v99_v58  ;;  %v4708_v27 = vsub.f32 %v4670_v39, %v1330_v10 }
 0x16a   :  { %v3927_v34 = vadd.f32 %v4634_v38, %v94_v51  ;;  %v1170_v38 = vld [vmem:[%s5060_s3 + $0x30] sm:$0xff] }
 0x16b   :  { %v1240_v60 = vsel %vm1220_vm1, %v1170_v38, 0  ;;  %v1332_v16 = vand.u32 4294901760, %v4708_v27 }
 0x1de   :  { %v3261_v61 = vpop.f32.mrb[0].mxu0 }
 0x1df   :  { %v4659_v30 = vadd.f32 %v3913_v46, %v3261_v61  ;;  %v1070_v3 = vpop.f32.mrb[1].mxu0  ;;  %v1350_v46 = vand.u32 4294901760, %v4702_v47 }
 0x1e0   :  { %v4664_v14 = vadd.f32 %v3915_v29, %v1070_v3  ;;  %v1171_v29 = vld [vmem:[%s5060_s3 + $0x38] sm:$0xff]  ;;  %v4730_v3 = vsub.f32 %v1234_v0, %v4710_v62 }
 0x1e1   :  { %v1125_v13 = vmin.f32 %v4659_v30, 0.0  ;;  %v4744_v40 = vsel %vm1220_vm1, %v1171_v29, 0  ;;  %vm1117_vm2 = vcmp.gt.f32.partialorder %v4659_v30, 0.0 }
 0x1e2   :  { %v1124_v56 = vmin.f32 %v4664_v14, 0.0  ;;  %v3264_v63 = vpop.f32.mrb[2].mxu0  ;;  %vm1116_vm3 = vcmp.gt.f32.partialorder %v4664_v14, 0.0  ;;  %v1360_v57 = vand.u32 4294901760, %v4730_v3 }
 0x1e3   :  { %v1134_v42 = vmul.f32 1.442695, %v1125_v13  ;;  %v4673_v43 = vadd.f32 %v3917_v23, %v3264_v63  ;;  %v1082_v9 = vpop.f32.mrb[3].mxu0  ;;  %v4736_v23 = vsub.f32 %v4693_v45, %v1340_v26  ;;  %v4739_v13 = vsub.f32 %v1237_v21, %v4718_v49 }
 0x1e4   :  { %v1132_v5 = vmul.f32 1.442695, %v1124_v56  ;;  %v4677_v6 = vadd.f32 %v3919_v22, %v1082_v9  ;;  %v4741_v63 = vand.u32 4294901760, %v1240_v60  ;;  %v4750_v9 = vsub.f32 %v4702_v47, %v1350_v46 }
 0x1e5   :  { %4026 = vpow2.f32 %v1134_v42  ;;  %v1127_v1 = vmin.f32 %v4673_v43, 0.0  ;;  %vm1119_vm4 = vcmp.gt.f32.partialorder %v4673_v43, 0.0 }
 0x1e6   :  { %4028 = vpow2.f32 %v1132_v5  ;;  %v1126_v32 = vmin.f32 %v4677_v6, 0.0  ;;  %v3267_v55 = vpop.f32.mrb[4].mxu0  ;;  %vm1118_vm5 = vcmp.gt.f32.partialorder %v4677_v6, 0.0 }
 0x1e7   :  { %v1138_v50 = vmul.f32 1.442695, %v1127_v1  ;;  %v4690_v52 = vadd.f32 %v3921_v15, %v3267_v55  ;;  %v1094_v11 = vpop.f32.mrb[5].mxu0 }
 0x1e8   :  { %v1136_v18 = vmul.f32 1.442695, %v1126_v32  ;;  %v4696_v17 = vadd.f32 %v3923_v7, %v1094_v11  ;;  %v1370_v7 = vand.u32 4294901760, %v4739_v13  ;;  %v4758_v32 = vand.u32 4294901760, %v4744_v40 }
 0x1e9   :  { %4030 = vpow2.f32 %v1138_v50  ;;  %v1129_v41 = vmin.f32 %v4690_v52, 0.0  ;;  %vm1121_vm6 = vcmp.gt.f32.partialorder %v4690_v52, 0.0 }
 0x1ea   :  { %4032 = vpow2.f32 %v1136_v18  ;;  %v1128_v2 = vmin.f32 %v4696_v17, 0.0  ;;  %v3270_v48 = vpop.f32.mrb[6].mxu0  ;;  %vm1120_vm7 = vcmp.gt.f32.partialorder %v4696_v17, 0.0 }
 0x1eb   :  { %v1142_v28 = vmul.f32 1.442695, %v1129_v41  ;;  %v4715_v37 = vadd.f32 %v3925_v24, %v3270_v48  ;;  %v1106_v54 = vpop.f32.mrb[7].mxu0 }
 0x1ec   :  { %v1140_v59 = vmul.f32 1.442695, %v1128_v2  ;;  %v4720_v20 = vadd.f32 %v3927_v34, %v1106_v54 }
 0x1ed   :  { %4034 = vpow2.f32 %v1142_v28  ;;  %v1131_v31 = vmin.f32 %v4715_v37, 0.0  ;;  %vm1123_vm8 = vcmp.gt.f32.partialorder %v4715_v37, 0.0 }
 0x1ee   :  { %4036 = vpow2.f32 %v1140_v59  ;;  %v1130_v61 = vmin.f32 %v4720_v20, 0.0  ;;  %vm1122_vm9 = vcmp.gt.f32.partialorder %v4720_v20, 0.0 }
 0x1ef   :  { %v4027_v4 = vpop.eup %4026  ;;  %v1146_v35 = vmul.f32 1.442695, %v1131_v31 }
 0x1f0   :  { %v4029_v36 = vpop.eup %4028  ;;  %v2698_v22 = vadd.f32 -1.0, %v4027_v4  ;;  %v1144_v56 = vmul.f32 1.442695, %v1130_v61 }
 0x1f1   :  { %v2697_v42 = vadd.f32 -1.0, %v4029_v36  ;;  %4038 = vpow2.f32 %v1146_v35 }
 0x1f2   :  { %v1157_v5 = vsel %vm1117_vm2, %v4659_v30, %v2698_v22  ;;  %4040 = vpow2.f32 %v1144_v56  ;;  %v4762_v30 = vsub.f32 %v1240_v60, %v4741_v63 }
 0x1f3   :  { %v4031_v15 = vpop.eup %4030  ;;  %v1249_v1 = vand.u32 4294901760, %v1157_v5  ;;  %v1156_v53 = vsel %vm1116_vm3, %v4664_v14, %v2697_v42 }
 0x1f4   :  { %v4033_v55 = vpop.eup %4032  ;;  %v1246_v58 = vand.u32 4294901760, %v1156_v53  ;;  %v2700_v50 = vadd.f32 -1.0, %v4031_v15 }
 0x1f5   :  { %v4764_v11 = vsub.f32 %v1157_v5, %v1249_v1  ;;  %v2699_v0 = vadd.f32 -1.0, %v4033_v55 }
 0x1f6   :  { %v4768_v14 = vpack.c.bf16 %v1249_v1, %v1246_v58  ;;  %v1400_v51 = vsub.f32 %v1156_v53, %v1246_v58  ;;  %v1159_v24 = vsel %vm1119_vm4, %v4673_v43, %v2700_v50 }
 0x1f7   :  { %v4035_v18 = vpop.eup %4034  ;;  %v1255_v21 = vand.u32 4294901760, %v1159_v24  ;;  %v1158_v34 = vsel %vm1118_vm5, %v4677_v6, %v2699_v0  ;;  %v1408_v41 = vand.u32 4294901760, %v4764_v11 }
 0x1f8   :  { %v4037_v2 = vpop.eup %4036  ;;  %v1252_v48 = vand.u32 4294901760, %v1158_v34  ;;  %v2702_v38 = vadd.f32 -1.0, %v4035_v18  ;;  %3746 = vmatprep.subr.bf16.mxu0 %v4768_v14  ;;  %v1401_v28 = vand.u32 4294901760, %v1400_v51  ;;  %v4777_v54 = vpack.c.bf16 %v4764_v11, %v1400_v51 }
 0x1f9   :  { %v1421_v43 = vsub.f32 %v1159_v24, %v1255_v21  ;;  %v2701_v59 = vadd.f32 -1.0, %v4037_v2  ;;  %3748 = vmatpush3.bf16.msra.mxu0 %v4768_v14  ;;  %v1409_v6 = vsub.f32 %v4764_v11, %v1408_v41 }
 0x1fa   :  { %v4782_v31 = vpack.c.bf16 %v1255_v21, %v1252_v48  ;;  %v1414_v60 = vsub.f32 %v1158_v34, %v1252_v48  ;;  %v1161_v29 = vsel %vm1121_vm6, %v4690_v52, %v2702_v38  ;;  %v1402_v61 = vsub.f32 %v1400_v51, %v1401_v28 }
 0x1fb   :  { %v4039_v4 = vpop.eup %4038  ;;  %v1261_v35 = vand.u32 4294901760, %v1161_v29  ;;  %v1160_v36 = vsel %vm1120_vm7, %v4696_v17, %v2701_v59  ;;  %v1410_v22 = vand.u32 4294901760, %v1409_v6  ;;  %v1422_v56 = vand.u32 4294901760, %v1421_v43 }
 0x1fc   :  { %v4041_v42 = vpop.eup %4040  ;;  %v1258_v5 = vand.u32 4294901760, %v1160_v36  ;;  %v2704_v15 = vadd.f32 -1.0, %v4039_v4  ;;  %3750 = vmatprep.subr.bf16.mxu0 %v4782_v31  ;;  %v1403_v1 = vand.u32 4294901760, %v1402_v61  ;;  %v1415_v53 = vand.u32 4294901760, %v1414_v60 }
 0x1fd   :  { %v1435_v55 = vsub.f32 %v1161_v29, %v1261_v35  ;;  %v2703_v58 = vadd.f32 -1.0, %v4041_v42  ;;  %3752 = vmatpush3.bf16.msra.mxu0 %v4782_v31  ;;  %v1423_v52 = vsub.f32 %v1421_v43, %v1422_v56  ;;  %v4792_v50 = vpack.c.bf16 %v1421_v43, %v1414_v60 }
 0x1fe   :  { %v4794_v11 = vpack.c.bf16 %v1261_v35, %v1258_v5  ;;  %v1428_v0 = vsub.f32 %v1160_v36, %v1258_v5  ;;  %v1163_v17 = vsel %vm1123_vm8, %v4715_v37, %v2704_v15  ;;  %v3761_v51 = vpack.c.bf16 %v1410_v22, %v1403_v1 }
 0x1ff   :  { %v1267_v24 = vand.u32 4294901760, %v1163_v17  ;;  %v1162_v18 = vsel %vm1122_vm9, %v4720_v20, %v2703_v58  ;;  %v1416_v21 = vsub.f32 %v1414_v60, %v1415_v53  ;;  %v1424_v34 = vand.u32 4294901760, %v1423_v52 }
 0x200   :  { %v1264_v2 = vand.u32 4294901760, %v1162_v18  ;;  %3754 = vmatprep.subr.bf16.mxu0 %v4794_v11  ;;  %3762 = vmatprep.subr.bf16.mxu1 %v3761_v51  ;;  %v1429_v48 = vand.u32 4294901760, %v1428_v0  ;;  %v1436_v38 = vand.u32 4294901760, %v1435_v55  ;;  %v3785_v43 = vpack.c.bf16 %v1435_v55, %v1428_v0 }
 0x201   :  { %v1449_v59 = vsub.f32 %v1163_v17, %v1267_v24  ;;  %3756 = vmatpush3.bf16.msra.mxu0 %v4794_v11  ;;  %3764 = vmatpush3.bf16.msra.mxu1 %v3761_v51  ;;  %v1417_v37 = vand.u32 4294901760, %v1416_v21  ;;  %v4804_v6 = vpack.c.bf16 %v1408_v41, %v1401_v28  ;;  %v4806_v29 = vpack.c.bf16 %v1422_v56, %v1415_v53 }
 0x202   :  { %v4808_v61 = vpack.c.bf16 %v1267_v24, %v1264_v2  ;;  %v1442_v20 = vsub.f32 %v1162_v18, %v1264_v2  ;;  %v1430_v60 = vsub.f32 %v1428_v0, %v1429_v48  ;;  %v1437_v4 = vsub.f32 %v1435_v55, %v1436_v38 }
 0x203   :  { %v3765_v35 = vpack.c.bf16 %v1424_v34, %v1417_v37  ;;  %v1450_v36 = vand.u32 4294901760, %v1449_v59  ;;  %v4812_v22 = vsub.f32 %v4744_v40, %v4758_v32  ;;  %v4814_v42 = vpack.c.bf16 %v1436_v38, %v1429_v48 }
 0x204   :  { %3758 = vmatprep.subr.bf16.mxu0 %v4808_v61  ;;  %v1431_v5 = vand.u32 4294901760, %v1430_v60  ;;  %v1438_v41 = vand.u32 4294901760, %v1437_v4  ;;  %v1443_v28 = vand.u32 4294901760, %v1442_v20  ;;  %v3789_v56 = vpack.c.bf16 %v1449_v59, %v1442_v20 }
 0x205   :  { %3766 = vmatprep.subr.bf16.mxu1 %v3765_v35  ;;  %3760 = vmatpush3.bf16.msra.mxu0 %v4808_v61  ;;  %v1342_v15 = vand.u32 4294901760, %v4736_v23  ;;  %v1451_v1 = vsub.f32 %v1449_v59, %v1450_v36  ;;  %v1361_v53 = vsub.f32 %v4730_v3, %v1360_v57  ;;  %v1380_v40 = vand.u32 4294901760, %v4762_v30 }
 0x206   :  { %3768 = vmatpush3.bf16.msra.mxu1 %v3765_v35  ;;  %v3769_v55 = vpack.c.bf16 %v1438_v41, %v1431_v5  ;;  %v1444_v58 = vsub.f32 %v1442_v20, %v1443_v28  ;;  %v4823_v52 = vpack.c.bf16 %v1450_v36, %v1443_v28  ;;  %v1352_v17 = vand.u32 4294901760, %v4750_v9 }
 0x207   :  { %v1452_v0 = vand.u32 4294901760, %v1451_v1  ;;  %v1371_v51 = vsub.f32 %v4739_v13, %v1370_v7  ;;  %v1390_v24 = vand.u32 4294901760, %v4812_v22  ;;  %v1362_v18 = vand.u32 4294901760, %v1361_v53 }
 0x208   :  { %3288 = vmatmul.mubr.f32.vlgmr.msra.gmra.mrb[8].mxu0 %v1332_v16  ;;  %3770 = vmatprep.subr.bf16.mxu1 %v3769_v55  ;;  %v1445_v23 = vand.u32 4294901760, %v1444_v58  ;;  %v1381_v21 = vsub.f32 %v4762_v30, %v1380_v40 }
 0x209   :  { %3290 = vmatprep.mubr.f32.mxu0 %v1342_v15  ;;  %v1372_v27 = vand.u32 4294901760, %v1371_v51  ;;  %v1391_v16 = vsub.f32 %v4812_v22, %v1390_v24 }
 0x20a   :  { %3772 = vmatpush3.bf16.msra.mxu1 %v3769_v55  ;;  %v3773_v34 = vpack.c.bf16 %v1452_v0, %v1445_v23  ;;  %v1382_v9 = vand.u32 4294901760, %v1381_v21 }
 0x20b   :  { %v1392_v2 = vand.u32 4294901760, %v1391_v16 }
 0x20c   :  { %3291 = vmatmul.mubr.f32.gmra.mrb[10].mxu0 %v1352_v17  ;;  %3774 = vmatprep.subr.bf16.mxu1 %v3773_v34 }
 0x20d   :  { %3293 = vmatprep.mubr.f32.mxu0 %v1362_v18 }
 0x20e   :  { %3776 = vmatpush3.bf16.msra.mxu1 %v3773_v34 }
 0x20f   :  { %3778 = vmatprep.subr.bf16.mxu1 %v4777_v54 }
 0x210   :  { %3294 = vmatmul.mubr.f32.gmra.mrb[12].mxu0 %v1372_v27 }
 0x211   :  { %3316 = vmatmul.mubr.f32.vlgmr.msra.gmra.mrb[8].mxu1 %v4657_v44  ;;  %3296 = vmatprep.mubr.f32.mxu0 %v1382_v9 }
 0x212   :  { %3780 = vmatpush3.bf16.msra.mxu1 %v4777_v54  ;;  %3318 = vmatprep.mubr.f32.mxu1 %v4675_v12 }
 0x213   :  { %3782 = vmatprep.subr.bf16.mxu1 %v4792_v50 }
 0x214   :  { %3297 = vmatmul.mubr.f32.gmra.mrb[14].mxu0 %v1392_v2 }
 0x215   :  { %3319 = vmatmul.mubr.f32.gmra.mrb[10].mxu1 %v4683_v19 }
 0x216   :  { %3784 = vmatpush3.bf16.msra.mxu1 %v4792_v50  ;;  %3321 = vmatprep.mubr.f32.mxu1 %v4710_v62 }
 0x217   :  { %3786 = vmatprep.subr.bf16.mxu1 %v3785_v43 }
 0x219   :  { %3322 = vmatmul.mubr.f32.gmra.mrb[12].mxu1 %v4718_v49 }
 0x21a   :  { %3788 = vmatpush3.bf16.msra.mxu1 %v3785_v43  ;;  %3324 = vmatprep.mubr.f32.mxu1 %v4741_v63 }
 0x21b   :  { %3790 = vmatprep.subr.bf16.mxu1 %v3789_v56 }
 0x21d   :  { %3325 = vmatmul.mubr.f32.gmra.mrb[14].mxu1 %v4758_v32 }
 0x21e   :  { %3792 = vmatpush3.bf16.msra.mxu1 %v3789_v56  ;;  %3343 = vmatprep.mubr.f32.mxu1 %v4643_v33  ;;  %v4083_v33 = vmov 0.0|0.0  }
 0x21f   :  { %3794 = vmatprep.subr.bf16.mxu1 %v4768_v14  ;;  %3841 = vmatprep.subr.bf16.mxu0 %v4083_v33 }
 0x221   :  { %3344 = vmatmul.mubr.f32.vlgmr.msra.gmra.mrb[8].mxu1 %v4670_v39 }
 0x222   :  { %3796 = vmatpush3.bf16.msra.mxu1 %v4768_v14  ;;  %3346 = vmatprep.mubr.f32.mxu1 %v4693_v45 }
 0x223   :  { %3798 = vmatprep.subr.bf16.mxu1 %v4782_v31 }
 0x225   :  { %3347 = vmatmul.mubr.f32.gmra.mrb[10].mxu1 %v4702_v47 }
 0x226   :  { %3800 = vmatpush3.bf16.msra.mxu1 %v4782_v31  ;;  %3349 = vmatprep.mubr.f32.mxu1 %v4730_v3 }
 0x227   :  { %3802 = vmatprep.subr.bf16.mxu1 %v4794_v11 }
 0x229   :  { %3350 = vmatmul.mubr.f32.gmra.mrb[12].mxu1 %v4739_v13 }
 0x22a   :  { %3804 = vmatpush3.bf16.msra.mxu1 %v4794_v11  ;;  %3352 = vmatprep.mubr.f32.mxu1 %v4762_v30 }
 0x22b   :  { %3806 = vmatprep.subr.bf16.mxu1 %v4808_v61 }
 0x22d   :  { %3353 = vmatmul.mubr.f32.gmra.mrb[14].mxu1 %v4812_v22 }
 0x22e   :  { %3808 = vmatpush3.bf16.msra.mxu1 %v4808_v61  ;;  %3371 = vmatprep.mubr.f32.mxu1 %v1320_v25 }
 0x22f   :  { %3810 = vmatprep.subr.bf16.mxu1 %v4804_v6 }
 0x231   :  { %3372 = vmatmul.mubr.f32.vlgmr.msra.gmra.mrb[8].mxu1 %v1330_v10 }
 0x232   :  { %3812 = vmatpush3.bf16.msra.mxu1 %v4804_v6  ;;  %3374 = vmatprep.mubr.f32.mxu1 %v1340_v26  ;;  %v1183_v26 = vpop.permute.xlu0 %1182 }
 0x233   :  { %3814 = vmatprep.subr.bf16.mxu1 %v4806_v29 }
 0x235   :  { %3375 = vmatmul.mubr.f32.gmra.mrb[10].mxu1 %v1350_v46 }
 0x236   :  { %3816 = vmatpush3.bf16.msra.mxu1 %v4806_v29  ;;  %3377 = vmatprep.mubr.f32.mxu1 %v1360_v57  ;;  %v1193_v46 = vpop.permute.xlu0 %1192  ;;  %v2131_v57 = vld [vmem:[%s5062_s5] sm:$0x1]  ;;  %s4086_s5 = smov [#allocation3]  }
 0x237   :  { %3818 = vmatprep.subr.bf16.mxu1 %v4814_v42  ;;  %s2689_s20 = sshll.u32 %s4086_s5, 4  ;;  %s2690_s20 = int_to_ptr.vmem [resolvable:$true] %s2689_s20 }
 0x238   :  { %s4058_s2 = scalar_lea.vmem %s2690_s20, 16  ;;  %s4062_s21 = scalar_lea.vmem %s2690_s20, 32 }
 0x239   :  { %3378 = vmatmul.mubr.f32.gmra.mrb[12].mxu1 %v1370_v7  ;;  %p4059_p0 = scmp.ne.s32.totalorder %s2690_s20, %s4058_s2  ;;  %p4063_p1 = scmp.lt.s32.totalorder %s2690_s20, %s2690_s20 }
 0x23a   :  { %3820 = vmatpush3.bf16.msra.mxu1 %v4814_v42  ;;  %3380 = vmatprep.mubr.f32.mxu1 %v1380_v40  ;;  %v1203_v43 = vpop.permute.xlu0 %1202  ;;  %p4064_p2 = scmp.lt.s32.totalorder %s4062_s21, %s4058_s2 }
 0x23b   :  { %3822 = vmatprep.subr.bf16.mxu1 %v4823_v52 }
 0x23c   :  { %p4065_p3 = por %p4064_p2, %p4063_p1 }
 0x23d   :  { %3381 = vmatmul.mubr.f32.gmra.mrb[14].mxu1 %v1390_v24 }
 0x23e   :  { %3824 = vmatpush3.bf16.msra.mxu1 %v4823_v52  ;;  %3399 = vmatprep.mubr.f32.mxu1 %v4640_v8  ;;  %v1213_v53 = vpop.permute.xlu0 %1212  ;;  %p4066_p4 = pnand %p4065_p3, %p4059_p0 }
 0x23f   :  { %3826 = vmatprep.subr.bf16.mxu1 %v4768_v14 }
 0x241   :  { %3400 = vmatmul.mubr.f32.vlgmr.msra.gmra.mrb[8].mxu1 %v4657_v44 }
 0x242   :  { %3828 = vmatpush3.bf16.msra.mxu1 %v4768_v14  ;;  %3402 = vmatprep.mubr.f32.mxu1 %v4675_v12 }
 0x243   :  { %3830 = vmatprep.subr.bf16.mxu1 %v4782_v31 }
 0x245   :  { %3403 = vmatmul.mubr.f32.gmra.mrb[10].mxu1 %v4683_v19 }
 0x246   :  { %3832 = vmatpush3.bf16.msra.mxu1 %v4782_v31  ;;  %3405 = vmatprep.mubr.f32.mxu1 %v4710_v62  ;;  %v2143_v31 = vsel %vm1220_vm1, %v2131_v57, 0 }
 0x247   :  { %3834 = vmatprep.subr.bf16.mxu1 %v4794_v11  ;;  %v4923_v20 = vand.u32 4294901760, %v2143_v31 }
 0x249   :  { %3406 = vmatmul.mubr.f32.gmra.mrb[12].mxu1 %v4718_v49  ;;  %v4932_v1 = vsub.f32 %v2143_v31, %v4923_v20 }
 0x24a   :  { %3836 = vmatpush3.bf16.msra.mxu1 %v4794_v11  ;;  %3408 = vmatprep.mubr.f32.mxu1 %v4741_v63 }
 0x24b   :  { %3838 = vmatprep.subr.bf16.mxu1 %v4808_v61  ;;  %v2220_v21 = vand.u32 4294901760, %v4932_v1 }
 0x24d   :  { %3409 = vmatmul.mubr.f32.gmra.mrb[14].mxu1 %v4758_v32 }
 0x24e   :  { %3840 = vmatpush3.bf16.msra.mxu1 %v4808_v61  ;;  %3427 = vmatprep.mubr.f32.mxu1 %v4640_v8  ;;  %v4085_v8 = vmov 0.0  }
 0x24f   :  { %3853 = vmatprep.subr.bf16.mxu1 %v4083_v33  ;;  %3455 = vmatprep.mubr.msk.f32.mxu0 %vm4084_vm10, %v4085_v8 }
 0x251   :  { %3428 = vmatmul.mubr.f32.vlgmr.msra.gmra.mrb[8].mxu1 %v4657_v44 }
 0x252   :  { %3430 = vmatprep.mubr.f32.mxu1 %v4675_v12 }
 0x255   :  { %3431 = vmatmul.mubr.f32.gmra.mrb[10].mxu1 %v4683_v19 }
 0x256   :  { %3433 = vmatprep.mubr.f32.mxu1 %v4710_v62  ;;  %v1188_v62 = vpop.permute.xlu1 %1187 }
 0x259   :  { %3434 = vmatmul.mubr.f32.gmra.mrb[12].mxu1 %v4718_v49 }
 0x25a   :  { %3436 = vmatprep.mubr.f32.mxu1 %v4741_v63  ;;  %v1198_v49 = vpop.permute.xlu1 %1197 }
 0x25d   :  { %3437 = vmatmul.mubr.f32.gmra.mrb[14].mxu1 %v4758_v32 }
 0x25e   :  { %3474 = vmatprep.mubr.msk.f32.mxu1 %vm4084_vm10, %v4085_v8  ;;  %v1208_v50 = vpop.permute.xlu1 %1207 }
 0x262   :  { %v1218_v28 = vpop.permute.xlu1 %1217 }
 0x2db   :  { %v3289_v25 = vpop.f32.mrb[8].mxu0 }
 0x2dc   :  { %v1324_v44 = vpop.f32.mrb[9].mxu0  ;;  %v1335_v3 = vadd.f32 %v3289_v25, %v1188_v62 }
 0x2dd   :  { %v1325_v13 = vadd.f32 %v1324_v44, %v1183_v26 }
 0x2df   :  { %v3292_v39 = vpop.f32.mrb[10].mxu0 }
 0x2e0   :  { %v1344_v12 = vpop.f32.mrb[11].mxu0  ;;  %v1355_v14 = vadd.f32 %v3292_v39, %v1198_v49  ;;  %v4946_v39 = vsub.f32 %v4932_v1, %v2220_v21 }
 0x2e1   :  { %v1345_v11 = vadd.f32 %v1344_v12, %v1193_v46 }
 0x2e2   :  { %v2222_v46 = vand.u32 4294901760, %v4946_v39  ;;  %v2138_v39 = vlaneseq }
 0x2e3   :  { %v3295_v19 = vpop.f32.mrb[12].mxu0 }
 0x2e4   :  { %v1364_v10 = vpop.f32.mrb[13].mxu0  ;;  %v1375_v60 = vadd.f32 %v3295_v19, %v1208_v50 }
 0x2e5   :  { %v1365_v35 = vadd.f32 %v1364_v10, %v1203_v43 }
 0x2e7   :  { %v3298_v45 = vpop.f32.mrb[14].mxu0 }
 0x2e8   :  { %v1384_v47 = vpop.f32.mrb[15].mxu0  ;;  %v1395_v40 = vadd.f32 %v3298_v45, %v1218_v28 }
 0x2e9   :  { %v1385_v58 = vadd.f32 %v1384_v47, %v1213_v53 }
 0x324   :  { %v3429_v63 = vpop.f32.mrb[8].mxu1 }
 0x325   :  { %v3930_v7 = vadd.f32 %v3429_v63, %v1335_v3  ;;  %v2037_v32 = vpop.f32.mrb[9].mxu1 }
 0x326   :  { %v3932_v30 = vadd.f32 %v2037_v32, %v1325_v13 }
 0x327   :  { %v2092_v54 = vmin.f32 %v3930_v7, 0.0  ;;  %vm2084_vm11 = vcmp.gt.f32.partialorder %v3930_v7, 0.0 }
 0x328   :  { %v2091_v48 = vmin.f32 %v3932_v30, 0.0  ;;  %v3432_v38 = vpop.f32.mrb[10].mxu1  ;;  %vm2083_vm12 = vcmp.gt.f32.partialorder %v3932_v30, 0.0 }
 0x329   :  { %v2101_v59 = vmul.f32 1.442695, %v2092_v54  ;;  %v4919_v37 = vadd.f32 %v3432_v38, %v1355_v14  ;;  %v2049_v6 = vpop.f32.mrb[11].mxu1 }
 0x32a   :  { %v2099_v29 = vmul.f32 1.442695, %v2091_v48  ;;  %v4921_v61 = vadd.f32 %v2049_v6, %v1345_v11 }
 0x32b   :  { %4042 = vpow2.f32 %v2101_v59  ;;  %v2094_v4 = vmin.f32 %v4919_v37, 0.0  ;;  %vm2086_vm13 = vcmp.gt.f32.partialorder %v4919_v37, 0.0 }
 0x32c   :  { %4044 = vpow2.f32 %v2099_v29  ;;  %v2093_v36 = vmin.f32 %v4921_v61, 0.0  ;;  %v3435_v22 = vpop.f32.mrb[12].mxu1  ;;  %vm2085_vm14 = vcmp.gt.f32.partialorder %v4921_v61, 0.0 }
 0x32d   :  { %v2105_v42 = vmul.f32 1.442695, %v2094_v4  ;;  %v4927_v5 = vadd.f32 %v3435_v22, %v1375_v60  ;;  %v2061_v41 = vpop.f32.mrb[13].mxu1 }
 0x32e   :  { %v2103_v56 = vmul.f32 1.442695, %v2093_v36  ;;  %v4929_v15 = vadd.f32 %v2061_v41, %v1365_v35 }
 0x32f   :  { %4046 = vpow2.f32 %v2105_v42  ;;  %v2096_v55 = vmin.f32 %v4927_v5, 0.0  ;;  %vm2088_vm15 = vcmp.gt.f32.partialorder %v4927_v5, 0.0 }
 0x330   :  { %4048 = vpow2.f32 %v2103_v56  ;;  %v2095_v52 = vmin.f32 %v4929_v15, 0.0  ;;  %v3438_v0 = vpop.f32.mrb[14].mxu1  ;;  %vm2087_vm0 = vcmp.gt.f32.partialorder %v4929_v15, 0.0 }
 0x331   :  { %v2109_v17 = vmul.f32 1.442695, %v2096_v55  ;;  %v4936_v23 = vadd.f32 %v3438_v0, %v1395_v40  ;;  %v2073_v51 = vpop.f32.mrb[15].mxu1 }
 0x332   :  { %v2107_v24 = vmul.f32 1.442695, %v2095_v52  ;;  %v4938_v18 = vadd.f32 %v2073_v51, %v1385_v58 }
 0x333   :  { %4050 = vpow2.f32 %v2109_v17  ;;  %v2098_v34 = vmin.f32 %v4936_v23, 0.0  ;;  %vm2090_vm1 = vcmp.gt.f32.partialorder %v4936_v23, 0.0 }
 0x334   :  { %4052 = vpow2.f32 %v2107_v24  ;;  %v2097_v27 = vmin.f32 %v4938_v18, 0.0  ;;  %vm2089_vm2 = vcmp.gt.f32.partialorder %v4938_v18, 0.0 }
 0x335   :  { %v4043_v16 = vpop.eup %4042  ;;  %v2113_v9 = vmul.f32 1.442695, %v2098_v34 }
 0x336   :  { %v4045_v2 = vpop.eup %4044  ;;  %v2706_v25 = vadd.f32 -1.0, %v4043_v16  ;;  %v2111_v44 = vmul.f32 1.442695, %v2097_v27 }
 0x337   :  { %v2705_v12 = vadd.f32 -1.0, %v4045_v2  ;;  %4054 = vpow2.f32 %v2113_v9 }
 0x338   :  { %v2124_v19 = vsel %vm2084_vm11, %v3930_v7, %v2706_v25  ;;  %4056 = vpow2.f32 %v2111_v44 }
 0x339   :  { %v4047_v10 = vpop.eup %4046  ;;  %v2149_v45 = vand.u32 4294901760, %v2124_v19  ;;  %v2123_v47 = vsel %vm2083_vm12, %v3932_v30, %v2705_v12 }
 0x33a   :  { %v4049_v62 = vpop.eup %4048  ;;  %v2146_v26 = vand.u32 4294901760, %v2123_v47  ;;  %v2708_v49 = vadd.f32 -1.0, %v4047_v10 }
 0x33b   :  { %v4950_v3 = vsub.f32 %v2124_v19, %v2149_v45  ;;  %v2707_v13 = vadd.f32 -1.0, %v4049_v62 }
 0x33c   :  { %v4954_v63 = vsub.f32 %v2123_v47, %v2146_v26  ;;  %v2126_v57 = vsel %vm2086_vm13, %v4919_v37, %v2708_v49  ;;  %v4958_v7 = vpack.c.bf16 %v2149_v45, %v2146_v26 }
 0x33d   :  { %v4051_v32 = vpop.eup %4050  ;;  %v2238_v30 = vand.u32 4294901760, %v4950_v3  ;;  %v2155_v14 = vand.u32 4294901760, %v2126_v57  ;;  %v2125_v54 = vsel %vm2085_vm14, %v4921_v61, %v2707_v13 }
 0x33e   :  { %v4053_v31 = vpop.eup %4052  ;;  %v2231_v50 = vand.u32 4294901760, %v4954_v63  ;;  %v2152_v11 = vand.u32 4294901760, %v2125_v54  ;;  %v2710_v48 = vadd.f32 -1.0, %v4051_v32  ;;  %3843 = vmatpush3.bf16.msra.mxu0 %v4958_v7  ;;  %v3866_v38 = vpack.c.bf16 %v4950_v3, %v4954_v63 }
 0x33f   :  { %v4967_v43 = vsub.f32 %v2126_v57, %v2155_v14  ;;  %v2709_v59 = vadd.f32 -1.0, %v4053_v31  ;;  %3844 = vmatprep.subr.bf16.mxu0 %v4083_v33  ;;  %v2239_v37 = vsub.f32 %v4950_v3, %v2238_v30 }
 0x340   :  { %v4972_v6 = vsub.f32 %v2125_v54, %v2152_v11  ;;  %v2128_v29 = vsel %vm2088_vm15, %v4927_v5, %v2710_v48  ;;  %v4977_v61 = vpack.c.bf16 %v2155_v14, %v2152_v11  ;;  %v2232_v60 = vsub.f32 %v4954_v63, %v2231_v50  ;;  %v2136_v63 = vpop.permute.xlu0 %2135 }
 0x341   :  { %v4055_v4 = vpop.eup %4054  ;;  %v2252_v35 = vand.u32 4294901760, %v4967_v43  ;;  %v2161_v36 = vand.u32 4294901760, %v2128_v29  ;;  %v2127_v22 = vsel %vm2087_vm0, %v4929_v15, %v2709_v59  ;;  %v2240_v42 = vand.u32 4294901760, %v2239_v37 }
 0x342   :  { %v4057_v41 = vpop.eup %4056  ;;  %v2245_v28 = vand.u32 4294901760, %v4972_v6  ;;  %v2158_v56 = vand.u32 4294901760, %v2127_v22  ;;  %v2712_v53 = vadd.f32 -1.0, %v4055_v4  ;;  %3846 = vmatpush3.bf16.msra.mxu0 %v4977_v61  ;;  %v2233_v5 = vand.u32 4294901760, %v2232_v60 }
 0x343   :  { %v2265_v40 = vsub.f32 %v2128_v29, %v2161_v36  ;;  %v2711_v55 = vadd.f32 -1.0, %v4057_v41  ;;  %3847 = vmatprep.subr.bf16.mxu0 %v4083_v33  ;;  %v2253_v58 = vsub.f32 %v4967_v43, %v2252_v35  ;;  %v3869_v52 = vpack.c.bf16 %v4967_v43, %v4972_v6 }
 0x344   :  { %v2258_v0 = vsub.f32 %v2127_v22, %v2158_v56  ;;  %v2130_v15 = vsel %vm2090_vm1, %v4936_v23, %v2712_v53  ;;  %v4993_v17 = vpack.c.bf16 %v2161_v36, %v2158_v56  ;;  %v3854_v51 = vpack.c.bf16 %v2240_v42, %v2233_v5 }
 0x345   :  { %v2266_v24 = vand.u32 4294901760, %v2265_v40  ;;  %v2167_v34 = vand.u32 4294901760, %v2130_v15  ;;  %v2129_v27 = vsel %vm2089_vm2, %v4938_v18, %v2711_v55  ;;  %v2246_v16 = vsub.f32 %v4972_v6, %v2245_v28 }
 0x346   :  { %v2259_v9 = vand.u32 4294901760, %v2258_v0  ;;  %v2164_v2 = vand.u32 4294901760, %v2129_v27  ;;  %3849 = vmatpush3.bf16.msra.mxu0 %v4993_v17  ;;  %3855 = vmatpush3.bf16.msra.mxu1 %v3854_v51  ;;  %v2254_v25 = vand.u32 4294901760, %v2253_v58  ;;  %v3872_v44 = vpack.c.bf16 %v2265_v40, %v2258_v0 }
 0x347   :  { %v2279_v12 = vsub.f32 %v2130_v15, %v2167_v34  ;;  %3850 = vmatprep.subr.bf16.mxu0 %v4083_v33  ;;  %3856 = vmatprep.subr.bf16.mxu1 %v4083_v33  ;;  %v2247_v23 = vand.u32 4294901760, %v2246_v16  ;;  %v2267_v19 = vsub.f32 %v2265_v40, %v2266_v24  ;;  %v3890_v10 = vpack.c.bf16 %v2238_v30, %v2231_v50 }
 0x348   :  { %v2272_v45 = vsub.f32 %v2129_v27, %v2164_v2  ;;  %v3851_v47 = vpack.c.bf16 %v2167_v34, %v2164_v2  ;;  %v2260_v18 = vsub.f32 %v2258_v0, %v2259_v9  ;;  %v3893_v62 = vpack.c.bf16 %v2252_v35, %v2245_v28 }
 0x349   :  { %v2280_v26 = vand.u32 4294901760, %v2279_v12  ;;  %v3857_v49 = vpack.c.bf16 %v2254_v25, %v2247_v23  ;;  %v2268_v13 = vand.u32 4294901760, %v2267_v19  ;;  %v3896_v57 = vpack.c.bf16 %v2266_v24, %v2259_v9 }
 0x34a   :  { %v2273_v32 = vand.u32 4294901760, %v2272_v45  ;;  %3852 = vmatpush3.bf16.msra.mxu0 %v3851_v47  ;;  %v2261_v14 = vand.u32 4294901760, %v2260_v18  ;;  %v3875_v54 = vpack.c.bf16 %v2279_v12, %v2272_v45 }
 0x34b   :  { %3858 = vmatpush3.bf16.msra.mxu1 %v3857_v49  ;;  %v2281_v31 = vsub.f32 %v2279_v12, %v2280_v26 }
 0x34c   :  { %3859 = vmatprep.subr.bf16.mxu1 %v4083_v33  ;;  %v3860_v11 = vpack.c.bf16 %v2268_v13, %v2261_v14  ;;  %v2274_v48 = vsub.f32 %v2272_v45, %v2273_v32  ;;  %v3899_v43 = vpack.c.bf16 %v2280_v26, %v2273_v32 }
 0x34d   :  { %3456 = vmatmul.mubr.f32.vlgmr.msra.gmra.mrb[16].mxu0 %v2222_v46  ;;  %v2282_v30 = vand.u32 4294901760, %v2281_v31  ;;  %v2139_v46 = vshrl.u32 %v2138_v39, 7 }
 0x34e   :  { %v2275_v50 = vand.u32 4294901760, %v2274_v48 }
 0x34f   :  { %3861 = vmatpush3.bf16.msra.mxu1 %v3860_v11  ;;  %v2140_v3 = vsub.s32 0, %v2139_v46 }
 0x350   :  { %3862 = vmatprep.subr.bf16.mxu1 %v4083_v33  ;;  %v3863_v59 = vpack.c.bf16 %v2282_v30, %v2275_v50 }
 0x353   :  { %3864 = vmatpush3.bf16.msra.mxu1 %v3863_v59 }
 0x354   :  { %3865 = vmatprep.subr.bf16.mxu1 %v4083_v33 }
 0x356   :  { %3475 = vmatmul.mubr.f32.vlgmr.msra.gmra.mrb[16].mxu1 %v4923_v20 }
 0x357   :  { %3867 = vmatpush3.bf16.msra.mxu1 %v3866_v38  ;;  %3493 = vmatprep.mubr.msk.f32.mxu1 %vm4084_vm10, %v4085_v8 }
 0x358   :  { %3868 = vmatprep.subr.bf16.mxu1 %v4083_v33 }
 0x35b   :  { %3870 = vmatpush3.bf16.msra.mxu1 %v3869_v52 }
 0x35c   :  { %3871 = vmatprep.subr.bf16.mxu1 %v4083_v33 }
 0x35f   :  { %3873 = vmatpush3.bf16.msra.mxu1 %v3872_v44 }
 0x360   :  { %3874 = vmatprep.subr.bf16.mxu1 %v4083_v33 }
 0x363   :  { %3876 = vmatpush3.bf16.msra.mxu1 %v3875_v54 }
 0x364   :  { %3877 = vmatprep.subr.bf16.mxu1 %v4083_v33 }
 0x366   :  { %3494 = vmatmul.mubr.f32.vlgmr.msra.gmra.mrb[16].mxu1 %v4932_v1 }
 0x367   :  { %3879 = vmatpush3.bf16.msra.mxu1 %v4958_v7  ;;  %3512 = vmatprep.mubr.msk.f32.mxu1 %vm4084_vm10, %v4085_v8 }
 0x368   :  { %3880 = vmatprep.subr.bf16.mxu1 %v4083_v33 }
 0x36b   :  { %3882 = vmatpush3.bf16.msra.mxu1 %v4977_v61 }
 0x36c   :  { %3883 = vmatprep.subr.bf16.mxu1 %v4083_v33 }
 0x36f   :  { %3885 = vmatpush3.bf16.msra.mxu1 %v4993_v17 }
 0x370   :  { %3886 = vmatprep.subr.bf16.mxu1 %v4083_v33 }
 0x373   :  { %3888 = vmatpush3.bf16.msra.mxu1 %v3851_v47 }
 0x374   :  { %3889 = vmatprep.subr.bf16.mxu1 %v4083_v33 }
 0x376   :  { %3513 = vmatmul.mubr.f32.vlgmr.msra.gmra.mrb[16].mxu1 %v2220_v21 }
 0x377   :  { %3891 = vmatpush3.bf16.msra.mxu1 %v3890_v10  ;;  %3531 = vmatprep.mubr.msk.f32.mxu1 %vm4084_vm10, %v4085_v8 }
 0x378   :  { %3892 = vmatprep.subr.bf16.mxu1 %v4083_v33 }
 0x37b   :  { %3894 = vmatpush3.bf16.msra.mxu1 %v3893_v62 }
 0x37c   :  { %3895 = vmatprep.subr.bf16.mxu1 %v4083_v33 }
 0x37f   :  { %3897 = vmatpush3.bf16.msra.mxu1 %v3896_v57 }
 0x380   :  { %3898 = vmatprep.subr.bf16.mxu1 %v4083_v33 }
 0x383   :  { %3900 = vmatpush3.bf16.msra.mxu1 %v3899_v43 }
 0x384   :  { %3901 = vmatprep.subr.bf16.mxu1 %v4083_v33 }
 0x386   :  { %3532 = vmatmul.mubr.f32.vlgmr.msra.gmra.mrb[16].mxu1 %v4923_v20 }
 0x387   :  { %3903 = vmatpush3.bf16.msra.mxu1 %v4958_v7  ;;  %3550 = vmatprep.mubr.msk.f32.mxu1 %vm4084_vm10, %v4085_v8  ;;  %v2141_v8 = vrot.slane %v2136_v63, %v2140_v3 }
 0x388   :  { %3904 = vmatprep.subr.bf16.mxu1 %v4083_v33 }
 0x38b   :  { %3906 = vmatpush3.bf16.msra.mxu1 %v4977_v61 }
 0x38c   :  { %3907 = vmatprep.subr.bf16.mxu1 %v4083_v33 }
 0x38f   :  { %3909 = vmatpush3.bf16.msra.mxu1 %v4993_v17 }
 0x390   :  { %3910 = vmatprep.subr.bf16.mxu1 %v4083_v33 }
 0x393   :  { %3912 = vmatpush3.bf16.msra.mxu1 %v3851_v47 }
 0x396   :  { %3551 = vmatmul.mubr.f32.vlgmr.msra.gmra.mrb[16].mxu1 %v4923_v20 }
 0x420   :  { %v2224_v1 = vpop.f32.mrb[16].mxu0 }
 0x421   :  { %v3457_v21 = vpop.f32.mrb[17].mxu0  ;;  %v2225_v7 = vadd.f32 %v2224_v1, %v2141_v8 }
 0x469   :  { %v2678_v38 = vpop.f32.mrb[16].mxu1 }
 0x46a   :  { %v3946_v37 = vadd.f32 %v2678_v38, %v2225_v7  ;;  %v3552_v6 = vpop.f32.mrb[17].mxu1 }
 0x46c   :  { %2682 = vst [vmem:[#allocation3] sm:$0x1] %v3946_v37 }
 0x46d   :  { %4069 = shalt.err (!%p4066_p4)
}
 0x46e   :  { %s4070_s24 = scalar_lea.hbm %s5064_s7, 16 }
 0x46f   :  { %p4071_p5 = scmp.ne.s32.totalorder %s5064_s7, %s4070_s24  ;;  %p4074_p6 = scmp.lt.u32.totalorder %s4070_s24, %s5064_s7 }
 0x471   :  { %p4076_p7 = pnand %p4074_p6, %p4071_p5 }
 0x473   :  { %4079 = shalt.err (!%p4076_p7)
}
 0x474   :  { %2692 = dma.vmem_to_hbm [thread:$0]  %s2690_s20, 16, %s5064_s7, [#allocation4]  }
 0x475   :  { %4080 = dma.done.wait [#allocation4], 16  }
 0x476   :  { %4081 = vsyncadd [#allocation4], 4294967280 }
 0x477   :  { %2696 = vsyncpa [#allocation4], 1 }

</bundles_post_ra>
